<compile_context>
chip_gen: v6e
topology: v6e:2x2x1
jax: 0.10.0
libtpu: 0.0.40
codegen_flags: <defaults>
</compile_context>

<pallas_src>
import functools

import jax
import jax.numpy as jnp
from jax import lax
from jax.experimental import pallas as pl
from jax.experimental.pallas import tpu as pltpu


def _round_up(a, b):
    return (a + b - 1) // b * b


def _make_vq_kernel(want_dist, dot_dtype):
    """Builds the per-(batch, time-tile) VQ kernel.

    Refs (in order):
      x_ref:    (1, D, tT)   f32  channels-first input slab
      cb_ref:   (Kp, D)      f32  codebook (K padded to a lane multiple)
      cbt_ref:  (D, Kp)      f32  codebook transposed (hoisted in wrapper)
      cbsq_ref: (1, Kp)      f32  per-code squared norms (padded codes = huge)
      [dist_ref:(1, tT, Kp)  f32  squared L2 distances]      (only if want_dist)
      idx_ref:  (1, 1, tT)   i32  argmin indices, lane-dense
      quant_ref:(1, D, tT)   f32  quantized vectors, channels-first
    """

    def kernel(x_ref, cb_ref, cbt_ref, cbsq_ref, *out_refs):
        x_cf = x_ref[0]                                      # (D, tT)
        # Kept explicit: transposing x (D <= Kp) is the minimal transpose; a
        # dim-0 contraction would just make Mosaic re-insert the relayout.
        x = jnp.transpose(x_cf, (1, 0))                      # (tT, D)  XLU
        cb = cb_ref[...]                                     # (Kp, D)
        cb_sq = cbsq_ref[...]                                # (1, Kp)

        # ||c||^2 - 2 x.c is enough for the argmin (||x||^2 is per-row const);
        # ||x||^2 is only added when distances are actually materialized.
        dots = lax.dot_general(x.astype(dot_dtype), cb.astype(dot_dtype),
                               (((1,), (1,)), ((), ())),
                               preferred_element_type=jnp.float32)   # (tT, Kp)
        base = cb_sq - 2.0 * dots
        if want_dist:
            x_sq = jnp.sum(x * x, axis=1, keepdims=True)             # (tT, 1)
            base = x_sq + base                                       # full dist

        # argmin over the codebook axis (first index on ties, like jnp.argmin)
        n_codes = cb.shape[0]
        col_ids = lax.broadcasted_iota(jnp.int32, base.shape, 1)     # (tT, Kp)
        min_val = jnp.min(base, axis=1, keepdims=True)               # (tT, 1)
        idx_col = jnp.min(jnp.where(base == min_val, col_ids, n_codes),
                          axis=1, keepdims=True).astype(jnp.int32)   # (tT, 1)

        # One-hot gather on the MXU, emitted directly in channels-first layout:
        #   quant[d, t] = sum_k cbt[d, k] * onehot[t, k]
        onehot = (col_ids == idx_col).astype(jnp.float32)            # (tT, Kp)
        quant = lax.dot_general(cbt_ref[...], onehot,
                                (((1,), (1,)), ((), ())),
                                preferred_element_type=jnp.float32)  # (D, tT)

        if want_dist:
            dist_ref, idx_ref, quant_ref = out_refs
            dist_ref[0] = base
        else:
            idx_ref, quant_ref = out_refs
        # Lane-dense index output: one tiny (tT,1)->(1,tT) relayout in-kernel
        # instead of a (tT, 1) masked-store output block.
        idx_ref[0] = jnp.transpose(idx_col, (1, 0))
        quant_ref[0] = quant

    return kernel


def _vmem_working_set(tile_t, d, k_pad, want_dist):
    """Conservative per-step VMEM estimate (bytes): double-buffered I/O blocks,
    in-body (tile_t, Kp) temporaries, and both codebook orientations x2 bufs."""
    f = 4
    per_step = 2 * (d * tile_t * f          # x input block
                    + d * tile_t * f        # quantized output block
                    + 8 * tile_t * f)       # lane-dense idx block (8-sublane pad)
    if want_dist:
        per_step += 2 * tile_t * k_pad * f
    body_tmp = 6 * tile_t * k_pad * f       # dots / base / iota / mask / onehot
    consts = 2 * (2 * k_pad * d * f + 8 * k_pad * f)
    return per_step + body_tmp + consts


def _choose_time_tiling(batch, t, d, k_pad, want_dist):
    """Pick (t_pad, tile_t): large 128-aligned time tiles bounded by a
    generation-safe VMEM budget, preferring >= 2 grid steps (v7x has 2 TCs)."""
    budget = 20 << 20                        # fits v5e / v6e / v7x comfortably
    if t < 128:
        t_pad = _round_up(max(t, 8), 8)
        return t_pad, t_pad
    t_pad = _round_up(t, 128)
    candidates = [c for c in (1024, 512, 256, 128) if t_pad % c == 0]
    best = None
    for c in candidates:                     # descending tile sizes
        if _vmem_working_set(c, d, k_pad, want_dist) > budget:
            continue
        if best is None:
            best = c
        if batch * (t_pad // c) >= 2:        # keep both v7x TensorCores busy
            return t_pad, c
    return t_pad, (best if best is not None else 128)


def _const_spec(shape, nbytes):
    """BlockSpec for a grid-constant input.  Large constants are requested
    single-buffered (they are never re-DMA'd; double-buffering wastes VMEM).
    Small constants keep the default (negligible footprint)."""
    if nbytes >= (1 << 20) and hasattr(pl, "Buffered"):
        return pl.BlockSpec(shape, lambda b, t: (0, 0),
                            pipeline_mode=pl.Buffered(1))
    return pl.BlockSpec(shape, lambda b, t: (0, 0))


def _run_vq_kernel(x_cf, codebook, want_dist, dot_dtype):
    """x_cf: (B, D, T) f32 channels-first; codebook: (K, D) f32."""
    B, D, T = x_cf.shape
    K = codebook.shape[0]
    K_pad = _round_up(K, 128)        # lane-dense distance block / full MXU tile

    cb = codebook
    cb_sq = jnp.sum(cb * cb, axis=1)
    if K_pad != K:
        cb = jnp.pad(cb, ((0, K_pad - K), (0, 0)))
        # Sentinel norms: padded codes can never win the argmin.
        cb_sq = jnp.concatenate(
            [cb_sq, jnp.full((K_pad - K,), 1e30, jnp.float32)])
    cb_t = jnp.transpose(cb, (1, 0))                     # (D, Kp), tiny, once
    cb_sq = cb_sq[None, :]                               # (1, Kp)

    t_pad, tile_t = _choose_time_tiling(B, T, D, K_pad, want_dist)
    if t_pad != T:
        x_cf = jnp.pad(x_cf, ((0, 0), (0, 0), (0, t_pad - T)))
    n_tt = t_pad // tile_t

    out_shape = []
    out_specs = []
    if want_dist:
        out_shape.append(jax.ShapeDtypeStruct((B, t_pad, K_pad), jnp.float32))
        out_specs.append(pl.BlockSpec((1, tile_t, K_pad),
                                      lambda b, t: (b, t, 0)))
    out_shape.append(jax.ShapeDtypeStruct((B, 1, t_pad), jnp.int32))
    out_specs.append(pl.BlockSpec((1, 1, tile_t), lambda b, t: (b, 0, t)))
    out_shape.append(jax.ShapeDtypeStruct((B, D, t_pad), jnp.float32))
    out_specs.append(pl.BlockSpec((1, D, tile_t), lambda b, t: (b, 0, t)))

    f = 4
    in_specs = [
        pl.BlockSpec((1, D, tile_t), lambda b, t: (b, 0, t)),
        _const_spec((K_pad, D), K_pad * D * f),
        _const_spec((D, K_pad), D * K_pad * f),
        _const_spec((1, K_pad), K_pad * f),
    ]

    ws = _vmem_working_set(tile_t, D, K_pad, want_dist)
    vmem_limit = int(min(48 << 20, max(32 << 20, 2 * ws)))

    outs = pl.pallas_call(
        _make_vq_kernel(want_dist, dot_dtype),
        out_shape=tuple(out_shape),
        grid_spec=pltpu.PrefetchScalarGridSpec(
            num_scalar_prefetch=0,
            grid=(B, n_tt),
            in_specs=in_specs,
            out_specs=out_specs,
        ),
        compiler_params=pltpu.CompilerParams(
            dimension_semantics=("parallel", "parallel"),
            vmem_limit_bytes=vmem_limit),
    )(x_cf, cb, cb_t, cb_sq)

    if want_dist:
        distances, idx_row, quantized = outs
        if t_pad != T or K_pad != K:
            distances = distances[:, :T, :K]
    else:
        idx_row, quantized = outs
        distances = None

    if t_pad != T:
        # Only needed when padding was applied; aligned inputs pay nothing.
        idx_row = idx_row[:, :, :T]
        quantized = quantized[:, :, :T]
    indices = jnp.swapaxes(idx_row, 1, 2)                # (B, T, 1), tiny i32
    return distances, indices, quantized


def vector_quantizer_forward(x, codebook, commitment_cost=0.25,
                             return_extras=True,
                             distance_matmul_dtype=jnp.float32):
    """Forward pass of VectorQuantizer (training mode;
    compute_distances_if_possible=False, record_codebook_stats=False).

    x:        (B, D, T) float32  channels-first, D == embedding_dim
    codebook: (K, D)    float32
    return_extras: materialize the (B, T, K) distances / one-hot encodings
        (matches the PyTorch module). False skips the largest HBM stream when
        those tensors are unused downstream.
    distance_matmul_dtype: set to jnp.bfloat16 on v6e/v7x to cut MXU passes
        for the distance matmul ~3x (slightly looser distance accuracy).
    """
    B, D, T = x.shape
    K, D_cb = codebook.shape
    assert D == D_cb, "embedding_dim mismatch"

    x_cf = x.astype(jnp.float32)
    distances, encoding_indices, quantized_cf = _run_vq_kernel(
        x_cf, codebook.astype(jnp.float32), return_extras,
        distance_matmul_dtype)

    # Dense compare+reduce code histogram (no scatter-add on TPU).
    idx_flat = encoding_indices.reshape(-1)                          # (B*T,)
    onehot_flat = (idx_flat[:, None]
                   == jnp.arange(K, dtype=jnp.int32)[None, :]).astype(jnp.float32)
    avg_probs = jnp.mean(onehot_flat, axis=0)                        # (K,)
    perplexity = jnp.exp(-jnp.sum(avg_probs * jnp.log(avg_probs + 1e-10)))
    encodings = onehot_flat.reshape(B, T, K) if return_extras else None

    # Losses (MSE is layout-invariant, so compute in channels-first directly).
    # stop_gradient mirrors the .detach() placement of the PyTorch module.
    # TODO(synk): true training gradients would need a custom_vjp around the
    # pallas_call; only the forward values are exercised here.
    diff_e = lax.stop_gradient(quantized_cf) - x_cf
    diff_q = quantized_cf - lax.stop_gradient(x_cf)
    e_latent_loss = jnp.mean(diff_e * diff_e)
    q_latent_loss = jnp.mean(diff_q * diff_q)
    commitment_loss = commitment_cost * e_latent_loss
    vq_loss = q_latent_loss + commitment_loss

    # Straight-through estimator; forward value == quantized, already (B, D, T).
    content = x_cf + lax.stop_gradient(quantized_cf - x_cf)

    # TODO(synk): eval-only pairwise distance lists (itertools combinations /
    # product) and concatenated_quantized are not computed in training mode.
    return {
        "content": content,
        "additional_content": {
            "perplexity": perplexity,
            "distances": distances,                    # (B, T, K) or None
            "encodings": encodings,                    # (B, T, K) or None
            "encoding_indices": encoding_indices,      # (B, T, 1)
            "encoding_distances": None,
            "embedding_distances": None,
            "frames_vs_embedding_distances": None,
            "concatenated_quantized": None,
        },
        "additional_losses": {
            "vq_loss": vq_loss,
            "constant_e_latent_loss": e_latent_loss,
            "constant_q_latent_loss": q_latent_loss,
            "constant_commitment_loss": commitment_loss,
        },
    }


if __name__ == "__main__":
    codebook_size = 128
    embedding_dim = 64
    batch = 2
    time_steps = 256

    key = jax.random.PRNGKey(0)
    k_x, k_cb = jax.random.split(key)

    # Deterministic init: uniform(-1/K, 1/K), like the nn.Embedding init.
    codebook = jax.random.uniform(
        k_cb, (codebook_size, embedding_dim),
        minval=-1.0 / codebook_size, maxval=1.0 / codebook_size,
        dtype=jnp.float32)

    # Channels-first input (B, embedding_dim, T), as the module expects.
    x = jax.random.normal(k_x, (batch, embedding_dim, time_steps),
                          dtype=jnp.float32)

    fwd = jax.jit(functools.partial(vector_quantizer_forward,
                                    commitment_cost=0.25))
    out = jax.block_until_ready(fwd(x, codebook))

    # --- sanity checks against a pure-JAX reference -------------------------
    ac = out["additional_content"]
    assert out["content"].shape == (batch, embedding_dim, time_steps)
    assert ac["distances"].shape == (batch, time_steps, codebook_size)
    assert ac["encodings"].shape == (batch, time_steps, codebook_size)
    assert ac["encoding_indices"].shape == (batch, time_steps, 1)

    xt = jnp.transpose(x, (0, 2, 1)).reshape(-1, embedding_dim)      # (N, D)
    ref_dots = jnp.matmul(xt, codebook.T, precision=lax.Precision.HIGHEST)
    ref_dist = (jnp.sum(xt ** 2, axis=1, keepdims=True)
                + jnp.sum(codebook ** 2, axis=1) - 2.0 * ref_dots)   # (N, K)
    kdist = ac["distances"].reshape(-1, codebook_size)
    assert bool(jnp.allclose(kdist, ref_dist, rtol=1e-4, atol=1e-2))

    # Kernel argmin must equal argmin of the kernel's own distances exactly.
    kidx = ac["encoding_indices"].reshape(-1)
    assert bool(jnp.array_equal(
        kidx, jnp.argmin(kdist, axis=1).astype(jnp.int32)))

    # Quantized (= content forward value) rows must be the selected code rows.
    kq = jnp.transpose(out["content"], (0, 2, 1)).reshape(-1, embedding_dim)
    assert bool(jnp.allclose(kq, codebook[kidx], rtol=1e-5, atol=1e-5))

    # Encodings are valid one-hot rows consistent with the indices.
    enc = ac["encodings"].reshape(-1, codebook_size)
    assert bool(jnp.all(jnp.sum(enc, axis=-1) == 1.0))
    assert bool(jnp.array_equal(jnp.argmax(enc, axis=-1).astype(jnp.int32), kidx))

    # --- lean path: distances / encodings gated off (review item) -----------
    fwd_lean = jax.jit(functools.partial(vector_quantizer_forward,
                                         commitment_cost=0.25,
                                         return_extras=False))
    out_lean = jax.block_until_ready(fwd_lean(x, codebook))
    ac_lean = out_lean["additional_content"]
    assert ac_lean["distances"] is None and ac_lean["encodings"] is None
    assert out_lean["content"].shape == (batch, embedding_dim, time_steps)
    lidx = ac_lean["encoding_indices"].reshape(-1)
    # Lean indices must minimize the true distances (within float tolerance);
    # exact parity with the full path is not asserted since near-degenerate
    # ties may resolve differently once ||x||^2 is folded into the distances.
    n = lidx.shape[0]
    picked = ref_dist[jnp.arange(n), lidx]
    assert bool(jnp.all(picked <= jnp.min(ref_dist, axis=1) + 1e-3))
    kq_lean = jnp.transpose(out_lean["content"], (0, 2, 1)).reshape(
        -1, embedding_dim)
    assert bool(jnp.allclose(kq_lean, codebook[lidx], rtol=1e-5, atol=1e-5))

    print("KERNEL_OK")
</pallas_src>

<mosaic_0001>
module attributes {stable_mosaic.version = 11 : i64} {
  func.func @kernel(%arg0: i32, %arg1: i32, %arg2: memref<1x64x256xf32, #tpu.memory_space<vmem>>, %arg3: memref<128x64xf32, #tpu.memory_space<vmem>>, %arg4: memref<64x128xf32, #tpu.memory_space<vmem>>, %arg5: memref<1x128xf32, #tpu.memory_space<vmem>>, %arg6: memref<1x256x128xf32, #tpu.memory_space<vmem>>, %arg7: memref<1x1x256xi32, #tpu.memory_space<vmem>>, %arg8: memref<1x64x256xf32, #tpu.memory_space<vmem>>) attributes {dimension_semantics = [#tpu.dimension_semantics<parallel>, #tpu.dimension_semantics<parallel>], iteration_bounds = array<i64: 2, 1>, scalar_prefetch = 0 : i64, scratch_operands = 0 : i64, tpu.core_type = #tpu.core_type<tc>, window_params = [{transform_indices = @transform_0, window_bounds = array<i64: 1, 64, 256>}, {pipeline_mode = #tpu.pipeline_mode<synchronous>, transform_indices = @transform_1, window_bounds = array<i64: 128, 64>}, {pipeline_mode = #tpu.pipeline_mode<synchronous>, transform_indices = @transform_2, window_bounds = array<i64: 64, 128>}, {pipeline_mode = #tpu.pipeline_mode<synchronous>, transform_indices = @transform_3, window_bounds = array<i64: 1, 128>}, {transform_indices = @transform_4, window_bounds = array<i64: 1, 256, 128>}, {transform_indices = @transform_5, window_bounds = array<i64: 1, 1, 256>}, {transform_indices = @transform_6, window_bounds = array<i64: 1, 64, 256>}]} {
    %c0 = arith.constant 0 : index
    %c0_0 = arith.constant 0 : index
    %c0_1 = arith.constant 0 : index
    %0 = vector.load %arg2[%c0, %c0_0, %c0_1] : memref<1x64x256xf32, #tpu.memory_space<vmem>>, vector<1x64x256xf32>
    %1 = vector.shape_cast %0 : vector<1x64x256xf32> to vector<64x256xf32>
    %2 = tpu.transpose %1, [1, 0] : vector<64x256xf32> -> vector<256x64xf32>
    %c0_2 = arith.constant 0 : index
    %c0_3 = arith.constant 0 : index
    %3 = vector.load %arg3[%c0_2, %c0_3] : memref<128x64xf32, #tpu.memory_space<vmem>>, vector<128x64xf32>
    %c0_4 = arith.constant 0 : index
    %c0_5 = arith.constant 0 : index
    %4 = vector.load %arg5[%c0_4, %c0_5] : memref<1x128xf32, #tpu.memory_space<vmem>>, vector<1x128xf32>
    %cst = arith.constant dense<0.000000e+00> : vector<256x128xf32>
    %5 = tpu.matmul %2, %3, %cst {dimension_numbers = #tpu.dot_dimension_numbers<[1], [1], [0], [0], [0, 0, 1, 0], [], []>} : vector<256x64xf32>, vector<128x64xf32>, vector<256x128xf32> -> vector<256x128xf32>
    %cst_6 = arith.constant 2.000000e+00 : f32
    %6 = vector.broadcast %cst_6 : f32 to vector<256x128xf32>
    %7 = arith.mulf %6, %5 : vector<256x128xf32>
    %8 = vector.broadcast %4 : vector<1x128xf32> to vector<256x128xf32>
    %9 = arith.subf %8, %7 : vector<256x128xf32>
    %10 = arith.mulf %2, %2 : vector<256x64xf32>
    %cst_7 = arith.constant dense<0.000000e+00> : vector<256xf32>
    %11 = vector.multi_reduction <add>, %10, %cst_7 [1] : vector<256x64xf32> to vector<256xf32>
    %12 = vector.shape_cast %11 : vector<256xf32> to vector<256x1xf32>
    %13 = vector.broadcast %12 : vector<256x1xf32> to vector<256x128xf32>
    %14 = arith.addf %13, %9 : vector<256x128xf32>
    %15 = tpu.iota {dimensions = array<i32: 1>} : vector<256x128xi32>
    %cst_8 = arith.constant dense<0x7F800000> : vector<256xf32>
    %16 = vector.multi_reduction <minimumf>, %14, %cst_8 [1] : vector<256x128xf32> to vector<256xf32>
    %17 = vector.shape_cast %16 : vector<256xf32> to vector<256x1xf32>
    %18 = vector.broadcast %17 : vector<256x1xf32> to vector<256x128xf32>
    %19 = arith.cmpf oeq, %14, %18 : vector<256x128xf32>
    %c128_i32 = arith.constant 128 : i32
    %20 = vector.broadcast %c128_i32 : i32 to vector<256x128xi32>
    %21 = arith.select %19, %15, %20 : vector<256x128xi1>, vector<256x128xi32>
    %cst_9 = arith.constant dense<2147483647> : vector<256xi32>
    %22 = vector.multi_reduction <minsi>, %21, %cst_9 [1] : vector<256x128xi32> to vector<256xi32>
    %23 = vector.shape_cast %22 : vector<256xi32> to vector<256x1xi32>
    %24 = vector.broadcast %23 : vector<256x1xi32> to vector<256x128xi32>
    %25 = arith.cmpi eq, %15, %24 : vector<256x128xi32>
    %26 = arith.extui %25 : vector<256x128xi1> to vector<256x128xi32>
    %27 = arith.sitofp %26 : vector<256x128xi32> to vector<256x128xf32>
    %c0_10 = arith.constant 0 : index
    %c0_11 = arith.constant 0 : index
    %28 = vector.load %arg4[%c0_10, %c0_11] : memref<64x128xf32, #tpu.memory_space<vmem>>, vector<64x128xf32>
    %cst_12 = arith.constant dense<0.000000e+00> : vector<64x256xf32>
    %29 = tpu.matmul %28, %27, %cst_12 {dimension_numbers = #tpu.dot_dimension_numbers<[1], [1], [0], [0], [0, 0, 1, 0], [], []>} : vector<64x128xf32>, vector<256x128xf32>, vector<64x256xf32> -> vector<64x256xf32>
    %c0_13 = arith.constant 0 : index
    %c0_14 = arith.constant 0 : index
    %c0_15 = arith.constant 0 : index
    %30 = vector.load %arg6[%c0_13, %c0_14, %c0_15] : memref<1x256x128xf32, #tpu.memory_space<vmem>>, vector<1x256x128xf32>
    %31 = vector.shape_cast %30 : vector<1x256x128xf32> to vector<256x128xf32>
    %32 = vector.shape_cast %14 : vector<256x128xf32> to vector<1x256x128xf32>
    tpu.vector_store %arg6[%c0_13, %c0_14, %c0_15], %32 {strides = array<i32>} : memref<1x256x128xf32, #tpu.memory_space<vmem>>, vector<1x256x128xf32>,
    %33 = tpu.transpose %23, [1, 0] : vector<256x1xi32> -> vector<1x256xi32>
    %c0_16 = arith.constant 0 : index
    %c0_17 = arith.constant 0 : index
    %c0_18 = arith.constant 0 : index
    %34 = vector.load %arg7[%c0_16, %c0_17, %c0_18] : memref<1x1x256xi32, #tpu.memory_space<vmem>>, vector<1x1x256xi32>
    %35 = vector.shape_cast %34 : vector<1x1x256xi32> to vector<1x256xi32>
    %36 = vector.shape_cast %33 : vector<1x256xi32> to vector<1x1x256xi32>
    tpu.vector_store %arg7[%c0_16, %c0_17, %c0_18], %36 {strides = array<i32>} : memref<1x1x256xi32, #tpu.memory_space<vmem>>, vector<1x1x256xi32>,
    %c0_19 = arith.constant 0 : index
    %c0_20 = arith.constant 0 : index
    %c0_21 = arith.constant 0 : index
    %37 = vector.load %arg8[%c0_19, %c0_20, %c0_21] : memref<1x64x256xf32, #tpu.memory_space<vmem>>, vector<1x64x256xf32>
    %38 = vector.shape_cast %37 : vector<1x64x256xf32> to vector<64x256xf32>
    %39 = vector.shape_cast %29 : vector<64x256xf32> to vector<1x64x256xf32>
    tpu.vector_store %arg8[%c0_19, %c0_20, %c0_21], %39 {strides = array<i32>} : memref<1x64x256xf32, #tpu.memory_space<vmem>>, vector<1x64x256xf32>,
    return
  }
  func.func @transform_0(%arg0: i32, %arg1: i32) -> (i32, i32, i32) {
    %c0_i32 = arith.constant 0 : i32
    %c0_i32_0 = arith.constant 0 : i32
    return %arg0, %c0_i32, %arg1 : i32, i32, i32
  }
  func.func @transform_1(%arg0: i32, %arg1: i32) -> (i32, i32) {
    %c0_i32 = arith.constant 0 : i32
    %c0_i32_0 = arith.constant 0 : i32
    %c0_i32_1 = arith.constant 0 : i32
    return %c0_i32, %c0_i32_0 : i32, i32
  }
  func.func @transform_2(%arg0: i32, %arg1: i32) -> (i32, i32) {
    %c0_i32 = arith.constant 0 : i32
    %c0_i32_0 = arith.constant 0 : i32
    %c0_i32_1 = arith.constant 0 : i32
    return %c0_i32, %c0_i32_0 : i32, i32
  }
  func.func @transform_3(%arg0: i32, %arg1: i32) -> (i32, i32) {
    %c0_i32 = arith.constant 0 : i32
    %c0_i32_0 = arith.constant 0 : i32
    %c0_i32_1 = arith.constant 0 : i32
    return %c0_i32, %c0_i32_0 : i32, i32
  }
  func.func @transform_4(%arg0: i32, %arg1: i32) -> (i32, i32, i32) {
    %c0_i32 = arith.constant 0 : i32
    %c0_i32_0 = arith.constant 0 : i32
    return %arg0, %arg1, %c0_i32 : i32, i32, i32
  }
  func.func @transform_5(%arg0: i32, %arg1: i32) -> (i32, i32, i32) {
    %c0_i32 = arith.constant 0 : i32
    %c0_i32_0 = arith.constant 0 : i32
    return %arg0, %c0_i32, %arg1 : i32, i32, i32
  }
  func.func @transform_6(%arg0: i32, %arg1: i32) -> (i32, i32, i32) {
    %c0_i32 = arith.constant 0 : i32
    %c0_i32_0 = arith.constant 0 : i32
    return %arg0, %c0_i32, %arg1 : i32, i32, i32
  }
}

</mosaic_0001>

<bundles_post_ra>
// kernel: vector_quantizer_forward.1
= control target key start
LH: loop header
LB: loop body
LE: loop exit
PB: predicated region body
PF: predicated region fallthrough
CT: control target
= control target key end

     0   :  { %12 = vsyncpa [#allocation3], 0  ;;  %s4063_s0 = inlined_call_operand.vmem [shape: f32[2,64,256], index: 0, kind: input, shape index: {}]   ;;  %s4064_s1 = inlined_call_operand.vmem [shape: f32[128,64], index: 1, kind: input, shape index: {}]   ;;  %s4065_s2 = inlined_call_operand.hbm [shape: f32[64,128], index: 2, kind: input, shape index: {}]   ;;  %s4066_s3 = inlined_call_operand.vmem [shape: f32[1,128], index: 3, kind: input, shape index: {}]   ;;  %s4067_s4 = inlined_call_operand.hbm [shape: f32[2,256,128], index: 4, kind: output, shape index: {0}]   ;;  %s4068_s5 = inlined_call_operand.vmem [shape: s32[2,1,256], index: 5, kind: output, shape index: {1}]   ;;  %s4069_s6 = inlined_call_operand.vmem [shape: f32[2,64,256], index: 6, kind: output, shape index: {2}]  }
   0x1   :  { %13 = vsyncpa [#allocation4], 0 }
   0x2   :  { %15 = vsyncpa [#allocation4 + $0x1], 0  ;;  %s2700_s21 = smov 0   ;;  %s2702_s22 = smov 0  }
   0x3   :  { %s2704_s23 = smov 0   ;;  %s2706_s24 = smov 0  }
   0x4   :  { %s2708_s25 = smov 0   ;;  %s2710_s26 = smov 0  }
   0x5 LB: > { %s2166_s27 = sadd.s32 4294967295, %s2655_s26   ;;  %s2167_s28 = sadd.s32 4294967294, %s2655_s26   ;;  %s2655_s26 = sphi %s2710_s26, %s21_s26   ;;  %s2651_s25 = sphi %s2708_s25, %s4112_s25   ;;  %s2647_s24 = sphi %s2706_s24, %s4111_s24   ;;  %s2643_s23 = sphi %s2704_s23, %s4110_s23   ;;  %s2639_s22 = sphi %s2702_s22, %s4109_s22   ;;  %s2635_s21 = sphi %s2700_s21, %s4108_s21  }
   0x6   : > { %s33_s29 = sadd.s32 1, %s2651_s25  ;;  %s133_s30 = sadd.s32 1, %s2643_s23 }
   0x7   : > { %p35_p0 = scmp.ge.s32.totalorder %s33_s29, 2  ;;  %p143_p1 = scmp.ne.s32.totalorder %s2643_s23, %s2639_s22 }
   0x8   : > { %p144_p2 = scmp.eq.s32.totalorder %s2166_s27, 1  ;;  %p149_p3 = scmp.ne.s32.totalorder %s2639_s22, %s2635_s21 }
   0x9   : > { %s4114_s29 = smov (%p35_p0, %s33_s29), 0  ;;  %p150_p5 = scmp.eq.s32.totalorder %s2167_s28, 1 }
   0xa   : > { %p2740_p4 = por %p144_p2, %p143_p1  ;;  %s128_s8 = ssub.s32 %s2651_s25, %s4114_s29 }
   0xb   : > { %p2168_p6 = scmp.ge.s32.totalorder %s2655_s26, 1  ;;  %p131_p7 = scmp.eq.s32.totalorder %s128_s8, 0 }
   0xc   : > { %p2747_p8 = por %p150_p5, %p149_p3  ;;  %p213_p9 = scmp.lt.s32.totalorder %s2655_s26, 3 }
   0xd   : > { %s2753_s10 = scalar_select %p131_p7, %s2643_s23, %s133_s30  }
   0xe   : > { %p2755_p10 = pnand %p2168_p6, %p213_p9  ;;  %p2759_p11 = scmp.eq.s32.totalorder %s2166_s27, 0 }
   0xf   : > { %s2657_s13 = smov [#allocation2]  }
  0x10   : > { %p2482_p12 = pneg %p2755_p10  ;;  %s228_s14 = sshll.u32 %s2657_s13, 4  ;;  %s229_s14 = int_to_ptr.vmem [resolvable:$true] %s228_s14 }
  0x11   : > { %s2560_s15 = scalar_lea.vmem %s229_s14, 1024  ;;  %p2568_p5 = scmp.lt.s32.totalorder %s229_s14, %s229_s14 }
  0x12   : > { %p2483_p13 = pnand %p2759_p11, %p2482_p12  ;;  %p2561_p1 = scmp.ne.s32.totalorder %s229_s14, %s2560_s15 }
  0x13   : > { %p2569_p6 = scmp.lt.s32.totalorder %s2560_s15, %s2560_s15 }
  0x14   : > { %p2551_p0 = pneg %p2483_p13 }
  0x15   : > { %p2570_p7 = por %p2569_p6, %p2568_p5 }
  0x16   : > { %p2563_p2 = pnand %p2561_p1, %p2551_p0 }
  0x18   : > { %p2564_p3 = pneg %p2563_p2 }
  0x1a   : > { %p2571_p9 = pnand %p2570_p7, %p2564_p3 }
  0x1c   : > { %2574 = shalt.err (!%p2571_p9)
}
  0x1d   : > { %s2658_s16 = smov 128   ;;  %s2659_s17 = smov 8  }
  0x1e   : > { %2485 = dma.hbm_to_vmem [thread:$0]  (!%p2483_p13), %s4065_s2, 1024, %s229_s14, [#allocation3], %s2658_s16, %s2658_s16, %s2659_s17  }
  0x1f   : > { %260 = sbr.rel (%p2755_p10) target bundleno = 1175 (0x497), region = 36 }
  0x24   : > { %2626 = dma.done.wait (%p2759_p11), [#allocation3], 1024  }
  0x25   : > { %2628 = vsyncadd (%p2759_p11), [#allocation3], 4294966272  ;;  %p312_p12 = scmp.lt.s32.totalorder %s2647_s24, 1  ;;  %vm438_vm0 = vcmask 523264   ;;  %v436_v4 = vld [vmem:[%s4064_s1 + $0x78] sm:$0xff]  ;;  %v435_v5 = vld [vmem:[%s4064_s1 + $0x70] sm:$0xff] }
  0x26   : > { %2396 = vmatprep.subr.msk.mxu0 %vm438_vm0, %v436_v4  ;;  %v434_v8 = vld [vmem:[%s4064_s1 + $0x68] sm:$0xff]  ;;  %v433_v11 = vld [vmem:[%s4064_s1 + $0x60] sm:$0xff]  ;;  %v432_v14 = vld [vmem:[%s4064_s1 + $0x58] sm:$0xff]  ;;  %s287_s19 = sand.u32 1, %s2639_s22   ;;  %s2299_s13 = sshll.u32 %s2647_s24, 12 }
  0x27   : > { %s2778_s20 = scalar_select %p312_p12, %s2647_s24, 1  ;;  %2397 = vmatpush3.xpose.msk.msra.mxu0 %vm438_vm0, %v436_v4  ;;  %v431_v17 = vld [vmem:[%s4064_s1 + $0x50] sm:$0xff]  ;;  %v430_v20 = vld [vmem:[%s4064_s1 + $0x48] sm:$0xff]  ;;  %v429_v23 = vld [vmem:[%s4064_s1 + $0x40] sm:$0xff] }
  0x28   : > { %2398 = vmatprep.subr.msk.mxu0 %vm438_vm0, %v435_v5  ;;  %v428_v24 = vld [vmem:[%s4064_s1 + $0x38] sm:$0xff]  ;;  %v427_v25 = vld [vmem:[%s4064_s1 + $0x30] sm:$0xff]  ;;  %v426_v26 = vld [vmem:[%s4064_s1 + $0x28] sm:$0xff]  ;;  %s2173_s28 = sshll.u32 %s287_s19, 8  ;;  %s3983_s17 = scalar_lea.hbm %s4067_s4, %s2299_s13 }
  0x29   : > { %s2297_s27 = sshll.u32 %s2778_s20, 7  ;;  %v425_v27 = vld [vmem:[%s4064_s1 + $0x20] sm:$0xff]  ;;  %v424_v28 = vld [vmem:[%s4064_s1 + $0x18] sm:$0xff]  ;;  %v423_v29 = vld [vmem:[%s4064_s1 + $0x10] sm:$0xff]  ;;  %s3128_s12 = scalar_lea.vmem [#allocation5], %s2173_s28 }
  0x2a   : > { %s2786_s8 = scalar_lea.vmem %s4063_s0, %s2297_s27  ;;  %v422_v30 = vld [vmem:[%s4064_s1 + $0x8] sm:$0xff]  ;;  %v421_v31 = vld [vmem:[%s4064_s1] sm:$0xff]  ;;  %s1998_s14 = sshll.u32 %s3128_s12, 4  ;;  %s3985_s14 = int_to_ptr.vmem [resolvable:$true] %s1998_s14 }
  0x2b   : > { %v342_v0 = vld [vmem:[%s2786_s8 + $0x8] sm:$0xff]  ;;  %v341_v1 = vld [vmem:[%s2786_s8] sm:$0xff]  ;;  %v344_v2 = vld [vmem:[%s2786_s8 + $0x18] sm:$0xff]  ;;  %2399 = vmatpush3.xpose.msk.msra.mxu0 %vm438_vm0, %v435_v5  ;;  %s2575_s18 = scalar_lea.vmem %s3985_s14, 4096  ;;  %s2661_s24 = smov [#allocation5]  }
  0x2c   : > { %389 = vxpose.xlu1.b32.start [1/8] (short) %v342_v0, 128  ;;  %357 = vxpose.xlu0.b32.start [1/8] (short) %v341_v1, 128  ;;  %v343_v3 = vld [vmem:[%s2786_s8 + $0x10] sm:$0xff]  ;;  %v346_v6 = vld [vmem:[%s2786_s8 + $0x28] sm:$0xff]  ;;  %v345_v7 = vld [vmem:[%s2786_s8 + $0x20] sm:$0xff]  ;;  %p2576_p10 = scmp.ne.s32.totalorder %s3985_s14, %s2575_s18  ;;  %s2579_s28 = sshll.u32 %s2661_s24, 4  ;;  %s2580_s28 = int_to_ptr.vmem [resolvable:$false] %s2579_s28 }
  0x2d   : > { %v348_v9 = vld [vmem:[%s2786_s8 + $0x38] sm:$0xff]  ;;  %v347_v10 = vld [vmem:[%s2786_s8 + $0x30] sm:$0xff]  ;;  %2400 = vmatprep.subr.msk.mxu0 %vm438_vm0, %v434_v8  ;;  %v350_v12 = vld [vmem:[%s2786_s8 + $0x48] sm:$0xff]  ;;  %s2581_s30 = scalar_lea.vmem %s2580_s28, 8192  ;;  %p2582_p0 = scmp.lt.s32.totalorder %s3985_s14, %s2580_s28 }
  0x2e   : > { %v349_v13 = vld [vmem:[%s2786_s8 + $0x40] sm:$0xff]  ;;  %v352_v15 = vld [vmem:[%s2786_s8 + $0x58] sm:$0xff]  ;;  %v351_v16 = vld [vmem:[%s2786_s8 + $0x50] sm:$0xff]  ;;  %p2577_p11 = pnand %p2576_p10, %p2740_p4  ;;  %p2583_p1 = scmp.lt.s32.totalorder %s2581_s30, %s2575_s18 }
  0x2f   : > { %2401 = vmatpush3.xpose.msk.msra.mxu0 %vm438_vm0, %v434_v8  ;;  %v354_v18 = vld [vmem:[%s2786_s8 + $0x68] sm:$0xff]  ;;  %v353_v19 = vld [vmem:[%s2786_s8 + $0x60] sm:$0xff]  ;;  %v356_v21 = vld [vmem:[%s2786_s8 + $0x78] sm:$0xff] }
  0x30   : > { %390 = vxpose.xlu1.b32.cont [2/8] (short) %v344_v2, 128  ;;  %358 = vxpose.xlu0.b32.cont [2/8] (short) %v343_v3, 128  ;;  %v355_v22 = vld [vmem:[%s2786_s8 + $0x70] sm:$0xff]  ;;  %s3989_s8 = scalar_lea.sflag [#allocation4], %s287_s19  ;;  %p2578_p13 = pneg %p2577_p11 }
  0x31   : > { %2402 = vmatprep.subr.msk.mxu0 %vm438_vm0, %v433_v11  ;;  %p2584_p2 = por %p2583_p1, %p2582_p0 }
  0x33   : > { %2403 = vmatpush3.xpose.msk.msra.mxu0 %vm438_vm0, %v433_v11  ;;  %p2585_p3 = pnand %p2584_p2, %p2578_p13 }
  0x34   : > { %391 = vxpose.xlu1.b32.cont [3/8] (short) %v346_v6, 128  ;;  %359 = vxpose.xlu0.b32.cont [3/8] (short) %v345_v7, 128 }
  0x35   : > { %2404 = vmatprep.subr.msk.mxu0 %vm438_vm0, %v432_v14 }
  0x37   : > { %2405 = vmatpush3.xpose.msk.msra.mxu0 %vm438_vm0, %v432_v14 }
  0x38   : > { %392 = vxpose.xlu1.b32.cont [4/8] (short) %v348_v9, 128  ;;  %360 = vxpose.xlu0.b32.cont [4/8] (short) %v347_v10, 128 }
  0x39   : > { %2406 = vmatprep.subr.msk.mxu0 %vm438_vm0, %v431_v17 }
  0x3b   : > { %2407 = vmatpush3.xpose.msk.msra.mxu0 %vm438_vm0, %v431_v17 }
  0x3c   : > { %393 = vxpose.xlu1.b32.cont [5/8] (short) %v350_v12, 128  ;;  %361 = vxpose.xlu0.b32.cont [5/8] (short) %v349_v13, 128 }
  0x3d   : > { %2408 = vmatprep.subr.msk.mxu0 %vm438_vm0, %v430_v20 }
  0x3f   : > { %2409 = vmatpush3.xpose.msk.msra.mxu0 %vm438_vm0, %v430_v20 }
  0x40   : > { %394 = vxpose.xlu1.b32.cont [6/8] (short) %v352_v15, 128  ;;  %362 = vxpose.xlu0.b32.cont [6/8] (short) %v351_v16, 128 }
  0x41   : > { %2410 = vmatprep.subr.msk.mxu0 %vm438_vm0, %v429_v23 }
  0x43   : > { %2411 = vmatpush3.xpose.msk.msra.mxu0 %vm438_vm0, %v429_v23 }
  0x44   : > { %395 = vxpose.xlu1.b32.cont [7/8] (short) %v354_v18, 128  ;;  %363 = vxpose.xlu0.b32.cont [7/8] (short) %v353_v19, 128 }
  0x45   : > { %2412 = vmatprep.subr.msk.mxu0 %vm438_vm0, %v428_v24 }
  0x47   : > { %2413 = vmatpush3.xpose.msk.msra.mxu0 %vm438_vm0, %v428_v24 }
  0x48   : > { %396 = vxpose.xlu1.b32.end [8/8] (short) %v356_v21, 128  ;;  %364 = vxpose.xlu0.b32.end [8/8] (short) %v355_v22, 128 }
  0x49   : > { %2414 = vmatprep.subr.msk.mxu0 %vm438_vm0, %v427_v25 }
  0x4b   : > { %2415 = vmatpush3.xpose.msk.msra.mxu0 %vm438_vm0, %v427_v25 }
  0x4c   : > { %2416 = vmatprep.subr.msk.mxu0 %vm438_vm0, %v426_v26 }
  0x4f   : > { %2417 = vmatpush3.xpose.msk.msra.mxu0 %vm438_vm0, %v426_v26 }
  0x50   : > { %2418 = vmatprep.subr.msk.mxu0 %vm438_vm0, %v425_v27 }
  0x53   : > { %2419 = vmatpush3.xpose.msk.msra.mxu0 %vm438_vm0, %v425_v27 }
  0x54   : > { %2420 = vmatprep.subr.msk.mxu0 %vm438_vm0, %v424_v28 }
  0x57   : > { %2421 = vmatpush3.xpose.msk.msra.mxu0 %vm438_vm0, %v424_v28 }
  0x58   : > { %2422 = vmatprep.subr.msk.mxu0 %vm438_vm0, %v423_v29 }
  0x5b   : > { %2423 = vmatpush3.xpose.msk.msra.mxu0 %vm438_vm0, %v423_v29 }
  0x5c   : > { %2424 = vmatprep.subr.msk.mxu0 %vm438_vm0, %v422_v30 }
  0x5f   : > { %2425 = vmatpush3.xpose.msk.msra.mxu0 %vm438_vm0, %v422_v30 }
  0x60   : > { %2426 = vmatprep.subr.msk.mxu0 %vm438_vm0, %v421_v31 }
  0x63   : > { %2427 = vmatpush3.xpose.msk.msra.mxu0 %vm438_vm0, %v421_v31 }
  0xa8   : > { %v2884_v32 = vpop.trf.xlu1  ;;  %v2886_v33 = vpop.trf.xlu0 }
  0xa9   : > { %2428 = vmatprep.mubr.msk.f32.mxu0 %vm438_vm0, %v2886_v33 }
  0xac   : > { %v2890_v34 = vpop.trf.xlu1  ;;  %v2892_v35 = vpop.trf.xlu0 }
  0xad   : > { %2429 = vmatmul.mubr.msk.f32.vlgmr.msra.gmra.mxu0 %vm438_vm0, %v2892_v35 }
  0xb0   : > { %v2896_v36 = vpop.trf.xlu1  ;;  %v2898_v37 = vpop.trf.xlu0 }
  0xb1   : > { %2431 = vmatprep.mubr.msk.f32.mxu0 %vm438_vm0, %v2898_v37 }
  0xb4   : > { %v2902_v38 = vpop.trf.xlu1  ;;  %v2904_v39 = vpop.trf.xlu0 }
  0xb5   : > { %2432 = vmatmul.mubr.msk.f32.gmra.mxu0 %vm438_vm0, %v2904_v39 }
  0xb8   : > { %v2908_v40 = vpop.trf.xlu1  ;;  %v2910_v41 = vpop.trf.xlu0 }
  0xb9   : > { %2434 = vmatprep.mubr.msk.f32.mxu0 %vm438_vm0, %v2910_v41 }
  0xbc   : > { %v2914_v42 = vpop.trf.xlu1  ;;  %v2916_v43 = vpop.trf.xlu0 }
  0xbd   : > { %2435 = vmatmul.mubr.msk.f32.gmra.mxu0 %vm438_vm0, %v2916_v43 }
  0xc0   : > { %v2920_v44 = vpop.trf.xlu1  ;;  %v2922_v45 = vpop.trf.xlu0 }
  0xc1   : > { %2437 = vmatprep.mubr.msk.f32.mxu0 %vm438_vm0, %v2922_v45 }
  0xc4   : > { %v2926_v46 = vpop.trf.xlu1  ;;  %v2928_v47 = vpop.trf.xlu0 }
  0xc5   : > { %2438 = vmatmul.mubr.msk.f32.gmra.mxu0 %vm438_vm0, %v2928_v47  ;;  %v901_v30 = vmul.f32 %v2926_v46, %v2926_v46 }
  0xc8   : > { %v2932_v48 = vpop.trf.xlu1  ;;  %v2934_v49 = vpop.trf.xlu0 }
  0xc9   : > { %2440 = vmatprep.mubr.msk.f32.mxu0 %vm438_vm0, %v2934_v49  ;;  %v902_v26 = vmul.f32 %v2932_v48, %v2932_v48  ;;  %v886_v31 = vmul.f32 %v2934_v49, %v2934_v49 }
  0xcb   : > { %v982_v28 = vsel %vm438_vm0, %v902_v26, 0.0 }
  0xcc   : > { %v2938_v50 = vpop.trf.xlu1  ;;  %v2940_v51 = vpop.trf.xlu0 }
  0xcd   : > { %2441 = vmatmul.mubr.msk.f32.gmra.mxu0 %vm438_vm0, %v2940_v51  ;;  %v903_v22 = vmul.f32 %v2938_v50, %v2938_v50  ;;  %v887_v27 = vmul.f32 %v2940_v51, %v2940_v51  ;;  %v900_v51 = vmul.f32 %v2920_v44, %v2920_v44 }
  0xcf   : > { %v985_v24 = vsel %vm438_vm0, %v903_v22, 0.0  ;;  %v937_v29 = vsel %vm438_vm0, %v887_v27, 0.0  ;;  %v976_v49 = vsel %vm438_vm0, %v900_v51, 0.0 }
  0xd0   : > { %v2944_v52 = vpop.trf.xlu1  ;;  %v383_v53 = vpop.trf.xlu0 }
  0xd1   : > { %2443 = vmatprep.mubr.msk.f32.mxu0 %vm438_vm0, %v383_v53  ;;  %v904_v18 = vmul.f32 %v2944_v52, %v2944_v52  ;;  %v888_v23 = vmul.f32 %v383_v53, %v383_v53  ;;  %v899_v53 = vmul.f32 %v2914_v42, %v2914_v42 }
  0xd3   : > { %v988_v20 = vsel %vm438_vm0, %v904_v18, 0.0  ;;  %v940_v25 = vsel %vm438_vm0, %v888_v23, 0.0 }
  0xd4   : > { %v2947_v54 = vpop.trf.xlu1  ;;  %v384_v55 = vpop.trf.xlu0 }
  0xd5   : > { %2444 = vmatmul.mubr.msk.f32.gmra.mxu0 %vm438_vm0, %v384_v55  ;;  %v905_v13 = vmul.f32 %v2947_v54, %v2947_v54  ;;  %v889_v19 = vmul.f32 %v384_v55, %v384_v55  ;;  %v898_v55 = vmul.f32 %v2908_v40, %v2908_v40 }
  0xd7   : > { %v991_v16 = vsel %vm438_vm0, %v905_v13, 0.0  ;;  %v943_v21 = vsel %vm438_vm0, %v889_v19, 0.0 }
  0xd8   : > { %v2950_v56 = vpop.trf.xlu1  ;;  %v385_v57 = vpop.trf.xlu0 }
  0xd9   : > { %2446 = vmatprep.mubr.msk.f32.mxu0 %vm438_vm0, %v385_v57  ;;  %v906_v9 = vmul.f32 %v2950_v56, %v2950_v56  ;;  %v890_v15 = vmul.f32 %v385_v57, %v385_v57  ;;  %v970_v57 = vsel %vm438_vm0, %v898_v55, 0.0 }
  0xdb   : > { %v994_v12 = vsel %vm438_vm0, %v906_v9, 0.0  ;;  %v946_v17 = vsel %vm438_vm0, %v890_v15, 0.0 }
  0xdc   : > { %v2953_v58 = vpop.trf.xlu1  ;;  %v386_v59 = vpop.trf.xlu0 }
  0xdd   : > { %2447 = vmatmul.mubr.msk.f32.gmra.mxu0 %vm438_vm0, %v386_v59  ;;  %v907_v4 = vmul.f32 %v2953_v58, %v2953_v58  ;;  %v891_v11 = vmul.f32 %v386_v59, %v386_v59 }
  0xdf   : > { %v997_v8 = vsel %vm438_vm0, %v907_v4, 0.0  ;;  %v949_v14 = vsel %vm438_vm0, %v891_v11, 0.0 }
  0xe0   : > { %v2956_v60 = vpop.trf.xlu1  ;;  %v387_v61 = vpop.trf.xlu0 }
  0xe1   : > { %2449 = vmatprep.mubr.msk.f32.mxu0 %vm438_vm0, %v387_v61  ;;  %v908_v62 = vmul.f32 %v2956_v60, %v2956_v60  ;;  %v892_v7 = vmul.f32 %v387_v61, %v387_v61 }
  0xe3   : > { %v1000_v63 = vsel %vm438_vm0, %v908_v62, 0.0  ;;  %v952_v10 = vsel %vm438_vm0, %v892_v7, 0.0  ;;  %v880_v62 = vmul.f32 %v2898_v37, %v2898_v37  ;;  %v878_v37 = vmul.f32 %v2886_v33, %v2886_v33 }
  0xe4   : > { %1001 = vadd.xlane.f32.xlu1 %v1000_v63  ;;  %v2962_v0 = vpop.trf.xlu1  ;;  %v388_v1 = vpop.trf.xlu0 }
  0xe5   : > { %2450 = vmatmul.mubr.msk.f32.gmra.mxu0 %vm438_vm0, %v388_v1  ;;  %v909_v2 = vmul.f32 %v2962_v0, %v2962_v0  ;;  %v893_v3 = vmul.f32 %v388_v1, %v388_v1 }
  0xe6   : > { %2452 = vmatprep.mubr.msk.f32.mxu0 %vm438_vm0, %v2884_v32 }
  0xe7   : > { %v1003_v5 = vsel %vm438_vm0, %v909_v2, 0.0  ;;  %v955_v6 = vsel %vm438_vm0, %v893_v3, 0.0  ;;  %v910_v2 = vsel %vm438_vm0, %v878_v37, 0.0 }
  0xe8   : > { %1004 = vadd.xlane.f32.xlu0 %v1003_v5  ;;  %956 = vadd.xlane.f32.xlu1 %v955_v6 }
  0xe9   : > { %2453 = vmatmul.mubr.msk.f32.gmra.mxu0 %vm438_vm0, %v2890_v34 }
  0xea   : > { %2455 = vmatprep.mubr.msk.f32.mxu0 %vm438_vm0, %v2896_v36 }
  0xec   : > { %998 = vadd.xlane.f32.xlu0 %v997_v8  ;;  %953 = vadd.xlane.f32.xlu1 %v952_v10 }
  0xed   : > { %2456 = vmatmul.mubr.msk.f32.gmra.mxu0 %vm438_vm0, %v2902_v38 }
  0xee   : > { %2458 = vmatprep.mubr.msk.f32.mxu0 %vm438_vm0, %v2908_v40 }
  0xf0   : > { %995 = vadd.xlane.f32.xlu0 %v994_v12  ;;  %950 = vadd.xlane.f32.xlu1 %v949_v14 }
  0xf1   : > { %2459 = vmatmul.mubr.msk.f32.gmra.mxu0 %vm438_vm0, %v2914_v42 }
  0xf2   : > { %2461 = vmatprep.mubr.msk.f32.mxu0 %vm438_vm0, %v2920_v44  ;;  %v973_v44 = vsel %vm438_vm0, %v899_v53, 0.0 }
  0xf4   : > { %992 = vadd.xlane.f32.xlu0 %v991_v16  ;;  %947 = vadd.xlane.f32.xlu1 %v946_v17 }
  0xf5   : > { %2462 = vmatmul.mubr.msk.f32.gmra.mxu0 %vm438_vm0, %v2926_v46  ;;  %v885_v46 = vmul.f32 %v2928_v47, %v2928_v47 }
  0xf6   : > { %2464 = vmatprep.mubr.msk.f32.mxu0 %vm438_vm0, %v2932_v48  ;;  %v979_v48 = vsel %vm438_vm0, %v901_v30, 0.0 }
  0xf8   : > { %989 = vadd.xlane.f32.xlu0 %v988_v20  ;;  %944 = vadd.xlane.f32.xlu1 %v943_v21 }
  0xf9   : > { %2465 = vmatmul.mubr.msk.f32.gmra.mxu0 %vm438_vm0, %v2938_v50  ;;  %v934_v50 = vsel %vm438_vm0, %v886_v31, 0.0 }
  0xfa   : > { %2467 = vmatprep.mubr.msk.f32.mxu0 %vm438_vm0, %v2944_v52  ;;  %v931_v52 = vsel %vm438_vm0, %v885_v46, 0.0 }
  0xfc   : > { %986 = vadd.xlane.f32.xlu0 %v985_v24  ;;  %941 = vadd.xlane.f32.xlu1 %v940_v25 }
  0xfd   : > { %2468 = vmatmul.mubr.msk.f32.gmra.mxu0 %vm438_vm0, %v2947_v54  ;;  %v884_v54 = vmul.f32 %v2922_v45, %v2922_v45  ;;  %v897_v45 = vmul.f32 %v2902_v38, %v2902_v38 }
  0xfe   : > { %2470 = vmatprep.mubr.msk.f32.mxu0 %vm438_vm0, %v2950_v56  ;;  %v883_v56 = vmul.f32 %v2916_v43, %v2916_v43  ;;  %v896_v43 = vmul.f32 %v2896_v36, %v2896_v36  ;;  %v916_v36 = vsel %vm438_vm0, %v880_v62, 0.0 }
  0xff   : > { %v928_v47 = vsel %vm438_vm0, %v884_v54, 0.0  ;;  %v967_v59 = vsel %vm438_vm0, %v897_v45, 0.0 }
 0x100   : > { %983 = vadd.xlane.f32.xlu0 %v982_v28  ;;  %938 = vadd.xlane.f32.xlu1 %v937_v29  ;;  %v925_v42 = vsel %vm438_vm0, %v883_v56, 0.0  ;;  %v964_v61 = vsel %vm438_vm0, %v896_v43, 0.0  ;;  %v3116_v28 = vld [vmem:[%s4066_s3] ss:$0 sm:$0xff] }
 0x101   : > { %2471 = vmatmul.mubr.msk.f32.gmra.mxu0 %vm438_vm0, %v2953_v58  ;;  %v882_v58 = vmul.f32 %v2910_v41, %v2910_v41  ;;  %v895_v41 = vmul.f32 %v2890_v34, %v2890_v34 }
 0x102   : > { %2473 = vmatprep.mubr.msk.f32.mxu0 %vm438_vm0, %v2956_v60  ;;  %v881_v60 = vmul.f32 %v2904_v39, %v2904_v39  ;;  %v894_v39 = vmul.f32 %v2884_v32, %v2884_v32 }
 0x103   : > { %v922_v40 = vsel %vm438_vm0, %v882_v58, 0.0  ;;  %v961_v63 = vsel %vm438_vm0, %v895_v41, 0.0 }
 0x104   : > { %980 = vadd.xlane.f32.xlu0 %v979_v48  ;;  %935 = vadd.xlane.f32.xlu1 %v934_v50  ;;  %v919_v38 = vsel %vm438_vm0, %v881_v60, 0.0  ;;  %v958_v1 = vsel %vm438_vm0, %v894_v39, 0.0 }
 0x105   : > { %2474 = vmatmul.mubr.msk.f32.gmra.mxu0 %vm438_vm0, %v2962_v0  ;;  %v879_v0 = vmul.f32 %v2892_v35, %v2892_v35 }
 0x107   : > { %v913_v34 = vsel %vm438_vm0, %v879_v0, 0.0 }
 0x108   : > { %977 = vadd.xlane.f32.xlu0 %v976_v49  ;;  %932 = vadd.xlane.f32.xlu1 %v931_v52 }
 0x10c   : > { %974 = vadd.xlane.f32.xlu0 %v973_v44  ;;  %929 = vadd.xlane.f32.xlu1 %v928_v47 }
 0x110   : > { %971 = vadd.xlane.f32.xlu0 %v970_v57  ;;  %926 = vadd.xlane.f32.xlu1 %v925_v42 }
 0x114   : > { %968 = vadd.xlane.f32.xlu0 %v967_v59  ;;  %923 = vadd.xlane.f32.xlu1 %v922_v40 }
 0x118   : > { %965 = vadd.xlane.f32.xlu0 %v964_v61  ;;  %920 = vadd.xlane.f32.xlu1 %v919_v38 }
 0x11c   : > { %962 = vadd.xlane.f32.xlu0 %v961_v63  ;;  %917 = vadd.xlane.f32.xlu1 %v916_v36 }
 0x120   : > { %959 = vadd.xlane.f32.xlu0 %v958_v1  ;;  %914 = vadd.xlane.f32.xlu1 %v913_v34 }
 0x124   : > { %911 = vadd.xlane.f32.xlu1 %v910_v2 }
 0x16d   : > { %v3078_v3 = vpop.xlane.xlu1 %1001  ;;  %v3084_v35 = vpop.f32.mrf.mxu0 }
 0x16f   : > { %v3090_v7 = vpop.f32.mrf.mxu0 }
 0x171   : > { %v3080_v32 = vpop.xlane.xlu1 %956  ;;  %v3082_v4 = vpop.xlane.xlu0 %1004 }
 0x175   : > { %v3086_v5 = vpop.xlane.xlu1 %953  ;;  %v3088_v6 = vpop.xlane.xlu0 %998 }
 0x176   : > { %v2433_v9 = vpop.f32.mrf.mxu0 }
 0x177   : > { %v811_v36 = vmul.f32 2.0, %v2433_v9 }
 0x178   : > { %v3100_v12 = vpop.f32.mrf.mxu0 }
 0x179   : > { %v3092_v33 = vpop.xlane.xlu1 %950  ;;  %v3094_v8 = vpop.xlane.xlu0 %995  ;;  %v849_v9 = vsub.f32 %v3116_v28, %v811_v36 }
 0x17d   : > { %v3096_v10 = vpop.xlane.xlu1 %947  ;;  %v3098_v11 = vpop.xlane.xlu0 %992 }
 0x17e   : > { %v2436_v13 = vpop.f32.mrf.mxu0 }
 0x17f   : > { %v813_v54 = vmul.f32 2.0, %v2436_v13 }
 0x180   : > { %v669_v16 = vpop.f32.mrf.mxu0 }
 0x181   : > { %v945_v14 = vpop.xlane.xlu1 %944  ;;  %v3102_v15 = vpop.xlane.xlu0 %989  ;;  %v851_v59 = vsub.f32 %v3116_v28, %v813_v54  ;;  %v812_v40 = vmul.f32 2.0, %v669_v16  ;;  %v810_v16 = vmul.f32 2.0, %v3100_v12 }
 0x183   : > { %v850_v39 = vsub.f32 %v3116_v28, %v812_v40  ;;  %v848_v12 = vsub.f32 %v3116_v28, %v810_v16 }
 0x185   : > { %v942_v17 = vpop.xlane.xlu1 %941  ;;  %v3104_v18 = vpop.xlane.xlu0 %986 }
 0x186   : > { %v2439_v19 = vpop.f32.mrf.mxu0 }
 0x187   : > { %v815_v23 = vmul.f32 2.0, %v2439_v19 }
 0x188   : > { %v679_v22 = vpop.f32.mrf.mxu0 }
 0x189   : > { %v939_v20 = vpop.xlane.xlu1 %938  ;;  %v3106_v21 = vpop.xlane.xlu0 %983  ;;  %v853_v30 = vsub.f32 %v3116_v28, %v815_v23  ;;  %v814_v31 = vmul.f32 2.0, %v679_v22 }
 0x18b   : > { %v852_v44 = vsub.f32 %v3116_v28, %v814_v31 }
 0x18d   : > { %v2442_v24 = vpop.f32.mrf.mxu0  ;;  %v936_v25 = vpop.xlane.xlu1 %935 }
 0x18e   : > { %v817_v26 = vmul.f32 2.0, %v2442_v24  ;;  %v3109_v27 = vpop.xlane.xlu0 %980 }
 0x18f   : > { %v689_v29 = vpop.f32.mrf.mxu0 }
 0x190   : > { %v855_v48 = vsub.f32 %v3116_v28, %v817_v26  ;;  %v816_v50 = vmul.f32 2.0, %v689_v29  ;;  %v809_v26 = vmul.f32 2.0, %v3084_v35 }
 0x191   : > { %v933_v51 = vpop.xlane.xlu1 %932 }
 0x192   : > { %v854_v46 = vsub.f32 %v3116_v28, %v816_v50  ;;  %v3121_v49 = vadd.f32 %v933_v51, %v853_v30  ;;  %v3123_v52 = vpop.xlane.xlu0 %977  ;;  %v3125_v53 = vadd.f32 %v939_v20, %v855_v48  ;;  %v847_v35 = vsub.f32 %v3116_v28, %v809_v26 }
 0x193   : > { %v808_v51 = vmul.f32 2.0, %v3090_v7 }
 0x194   : > { %1840 = vst [vmem:[%s3128_s12 + $0x38] sm:$0xff] %v3121_v49  ;;  %1842 = vst [vmem:[%s3128_s12 + $0x48] sm:$0xff] %v3125_v53  ;;  %v3134_v47 = vadd.f32 %v936_v25, %v854_v46 }
 0x195   : > { %v2445_v55 = vpop.f32.mrf.mxu0  ;;  %v930_v56 = vpop.xlane.xlu1 %929  ;;  %v846_v7 = vsub.f32 %v3116_v28, %v808_v51 }
 0x196   : > { %v819_v57 = vmul.f32 2.0, %v2445_v55  ;;  %v3136_v42 = vadd.f32 %v930_v56, %v852_v44  ;;  %v3138_v45 = vpop.xlane.xlu0 %974  ;;  %1841 = vst [vmem:[%s3128_s12 + $0x40] sm:$0xff] %v3134_v47 }
 0x197   : > { %v699_v58 = vpop.f32.mrf.mxu0 }
 0x198   : > { %v857_v43 = vsub.f32 %v3116_v28, %v819_v57  ;;  %1839 = vst [vmem:[%s3128_s12 + $0x30] sm:$0xff] %v3136_v42  ;;  %v818_v60 = vmul.f32 2.0, %v699_v58 }
 0x199   : > { %v927_v61 = vpop.xlane.xlu1 %926 }
 0x19a   : > { %v856_v38 = vsub.f32 %v3116_v28, %v818_v60  ;;  %v3147_v41 = vadd.f32 %v927_v61, %v851_v59  ;;  %v3149_v62 = vpop.xlane.xlu0 %971  ;;  %v3151_v63 = vadd.f32 %v945_v14, %v857_v43 }
 0x19c   : > { %1838 = vst [vmem:[%s3128_s12 + $0x28] sm:$0xff] %v3147_v41  ;;  %1844 = vst [vmem:[%s3128_s12 + $0x58] sm:$0xff] %v3151_v63  ;;  %v3158_v0 = vadd.f32 %v942_v17, %v856_v38 }
 0x19d   : > { %v2448_v1 = vpop.f32.mrf.mxu0  ;;  %v924_v34 = vpop.xlane.xlu1 %923 }
 0x19e   : > { %v821_v37 = vmul.f32 2.0, %v2448_v1  ;;  %v3160_v2 = vadd.f32 %v924_v34, %v850_v39  ;;  %v969_v13 = vpop.xlane.xlu0 %968  ;;  %1843 = vst [vmem:[%s3128_s12 + $0x50] sm:$0xff] %v3158_v0 }
 0x19f   : > { %v709_v14 = vpop.f32.mrf.mxu0 }
 0x1a0   : > { %v859_v19 = vsub.f32 %v3116_v28, %v821_v37  ;;  %1837 = vst [vmem:[%s3128_s12 + $0x20] sm:$0xff] %v3160_v2  ;;  %v820_v17 = vmul.f32 2.0, %v709_v14 }
 0x1a1   : > { %v921_v20 = vpop.xlane.xlu1 %920 }
 0x1a2   : > { %v858_v22 = vsub.f32 %v3116_v28, %v820_v17  ;;  %v3170_v23 = vadd.f32 %v921_v20, %v849_v9  ;;  %v966_v24 = vpop.xlane.xlu0 %965  ;;  %v3173_v25 = vadd.f32 %v3092_v33, %v859_v19 }
 0x1a4   : > { %1836 = vst [vmem:[%s3128_s12 + $0x18] sm:$0xff] %v3170_v23  ;;  %1846 = vst [vmem:[%s3128_s12 + $0x68] sm:$0xff] %v3173_v25  ;;  %v3182_v29 = vadd.f32 %v3096_v10, %v858_v22 }
 0x1a5   : > { %v2451_v30 = vpop.f32.mrf.mxu0  ;;  %v918_v31 = vpop.xlane.xlu1 %917 }
 0x1a6   : > { %v823_v48 = vmul.f32 2.0, %v2451_v30  ;;  %v3184_v50 = vadd.f32 %v918_v31, %v848_v12  ;;  %1845 = vst [vmem:[%s3128_s12 + $0x60] sm:$0xff] %v3182_v29  ;;  %v963_v10 = vpop.xlane.xlu0 %962 }
 0x1a7   : > { %v719_v33 = vpop.f32.mrf.mxu0 }
 0x1a8   : > { %v861_v46 = vsub.f32 %v3116_v28, %v823_v48  ;;  %1835 = vst [vmem:[%s3128_s12 + $0x10] sm:$0xff] %v3184_v50  ;;  %v822_v54 = vmul.f32 2.0, %v719_v33 }
 0x1a9   : > { %v2454_v44 = vpop.f32.mrf.mxu0  ;;  %v915_v55 = vpop.xlane.xlu1 %914 }
 0x1aa   : > { %v860_v56 = vsub.f32 %v3116_v28, %v822_v54  ;;  %v825_v57 = vmul.f32 2.0, %v2454_v44  ;;  %v3194_v58 = vadd.f32 %v915_v55, %v847_v35  ;;  %v3197_v59 = vadd.f32 %v3080_v32, %v861_v46  ;;  %v960_v37 = vpop.xlane.xlu0 %959 }
 0x1ab   : > { %v729_v40 = vpop.f32.mrf.mxu0 }
 0x1ac   : > { %v863_v43 = vsub.f32 %v3116_v28, %v825_v57  ;;  %1834 = vst [vmem:[%s3128_s12 + $0x8] sm:$0xff] %v3194_v58  ;;  %v824_v60 = vmul.f32 2.0, %v729_v40  ;;  %1070 = vmin.xlane.f32.xlu1 %v3197_v59  ;;  %1848 = vst [vmem:[%s3128_s12 + $0x78] sm:$0xff] %v3197_v59  ;;  %v3207_v61 = vadd.f32 %v3086_v5, %v860_v56 }
 0x1ad   : > { %v2457_v38 = vpop.f32.mrf.mxu0  ;;  %v912_v32 = vpop.xlane.xlu1 %911 }
 0x1ae   : > { %v862_v36 = vsub.f32 %v3116_v28, %v824_v60  ;;  %v827_v39 = vmul.f32 2.0, %v2457_v38  ;;  %v3210_v1 = vadd.f32 %v912_v32, %v846_v7  ;;  %1847 = vst [vmem:[%s3128_s12 + $0x70] sm:$0xff] %v3207_v61  ;;  %v3214_v34 = vadd.f32 %v963_v10, %v863_v43 }
 0x1af   : > { %v739_v14 = vpop.f32.mrf.mxu0 }
 0x1b0   : > { %v865_v9 = vsub.f32 %v3116_v28, %v827_v39  ;;  %1833 = vst [vmem:[%s3128_s12] sm:$0xff] %v3210_v1  ;;  %v826_v5 = vmul.f32 2.0, %v739_v14  ;;  %1068 = vmin.xlane.f32.xlu1 %v3207_v61  ;;  %1850 = vst [vmem:[%s3128_s12 + $0x88] sm:$0xff] %v3214_v34  ;;  %v3222_v16 = vadd.f32 %v960_v37, %v862_v36 }
 0x1b1   : > { %v2460_v19 = vpop.f32.mrf.mxu0 }
 0x1b2   : > { %v864_v17 = vsub.f32 %v3116_v28, %v826_v5  ;;  %v829_v20 = vmul.f32 2.0, %v2460_v19  ;;  %v3225_v22 = vadd.f32 %v969_v13, %v865_v9  ;;  %1849 = vst [vmem:[%s3128_s12 + $0x80] sm:$0xff] %v3222_v16 }
 0x1b3   : > { %v749_v26 = vpop.f32.mrf.mxu0 }
 0x1b4   : > { %v867_v12 = vsub.f32 %v3116_v28, %v829_v20  ;;  %v828_v30 = vmul.f32 2.0, %v749_v26  ;;  %1066 = vmin.xlane.f32.xlu1 %v3173_v25  ;;  %1852 = vst [vmem:[%s3128_s12 + $0x98] sm:$0xff] %v3225_v22  ;;  %v3233_v31 = vadd.f32 %v966_v24, %v864_v17 }
 0x1b5   : > { %v2463_v48 = vpop.f32.mrf.mxu0 }
 0x1b6   : > { %v866_v33 = vsub.f32 %v3116_v28, %v828_v30  ;;  %v831_v35 = vmul.f32 2.0, %v2463_v48  ;;  %v3237_v13 = vadd.f32 %v3138_v45, %v867_v12  ;;  %1851 = vst [vmem:[%s3128_s12 + $0x90] sm:$0xff] %v3233_v31 }
 0x1b7   : > { %v759_v51 = vpop.f32.mrf.mxu0 }
 0x1b8   : > { %v869_v46 = vsub.f32 %v3116_v28, %v831_v35  ;;  %v830_v10 = vmul.f32 2.0, %v759_v51  ;;  %1064 = vmin.xlane.f32.xlu1 %v3182_v29  ;;  %1854 = vst [vmem:[%s3128_s12 + $0xa8] sm:$0xff] %v3237_v13  ;;  %v3246_v24 = vadd.f32 %v3149_v62, %v866_v33 }
 0x1b9   : > { %v2466_v54 = vpop.f32.mrf.mxu0 }
 0x1ba   : > { %v868_v44 = vsub.f32 %v3116_v28, %v830_v10  ;;  %v833_v45 = vmul.f32 2.0, %v2466_v54  ;;  %v3250_v55 = vadd.f32 %v3109_v27, %v869_v46  ;;  %1853 = vst [vmem:[%s3128_s12 + $0xa0] sm:$0xff] %v3246_v24 }
 0x1bb   : > { %v769_v56 = vpop.f32.mrf.mxu0 }
 0x1bc   : > { %v871_v57 = vsub.f32 %v3116_v28, %v833_v45  ;;  %v832_v40 = vmul.f32 2.0, %v769_v56  ;;  %1062 = vmin.xlane.f32.xlu1 %v3151_v63  ;;  %1856 = vst [vmem:[%s3128_s12 + $0xb8] sm:$0xff] %v3250_v55  ;;  %v3259_v62 = vadd.f32 %v3123_v52, %v868_v44 }
 0x1bd   : > { %v2469_v7 = vpop.f32.mrf.mxu0 }
 0x1be   : > { %v870_v43 = vsub.f32 %v3116_v28, %v832_v40  ;;  %v835_v27 = vmul.f32 2.0, %v2469_v7  ;;  %v3263_v60 = vadd.f32 %v3104_v18, %v871_v57  ;;  %1855 = vst [vmem:[%s3128_s12 + $0xb0] sm:$0xff] %v3259_v62 }
 0x1bf   : > { %v779_v38 = vpop.f32.mrf.mxu0 }
 0x1c0   : > { %v873_v32 = vsub.f32 %v3116_v28, %v835_v27  ;;  %v834_v36 = vmul.f32 2.0, %v779_v38  ;;  %1060 = vmin.xlane.f32.xlu1 %v3158_v0  ;;  %1858 = vst [vmem:[%s3128_s12 + $0xc8] sm:$0xff] %v3263_v60  ;;  %v3272_v52 = vadd.f32 %v3106_v21, %v870_v43 }
 0x1c1   : > { %v2472_v39 = vpop.f32.mrf.mxu0 }
 0x1c2   : > { %v872_v37 = vsub.f32 %v3116_v28, %v834_v36  ;;  %v837_v18 = vmul.f32 2.0, %v2472_v39  ;;  %v3276_v14 = vadd.f32 %v3098_v11, %v873_v32  ;;  %1857 = vst [vmem:[%s3128_s12 + $0xc0] sm:$0xff] %v3272_v52 }
 0x1c3   : > { %v789_v9 = vpop.f32.mrf.mxu0 }
 0x1c4   : > { %v875_v5 = vsub.f32 %v3116_v28, %v837_v18  ;;  %v836_v19 = vmul.f32 2.0, %v789_v9  ;;  %1058 = vmin.xlane.f32.xlu1 %v3125_v53  ;;  %1860 = vst [vmem:[%s3128_s12 + $0xd8] sm:$0xff] %v3276_v14  ;;  %v3285_v21 = vadd.f32 %v3102_v15, %v872_v37 }
 0x1c5   : > { %v2475_v17 = vpop.f32.mrf.mxu0 }
 0x1c6   : > { %v874_v20 = vsub.f32 %v3116_v28, %v836_v19  ;;  %v839_v11 = vmul.f32 2.0, %v2475_v17  ;;  %v3289_v26 = vadd.f32 %v3088_v6, %v875_v5  ;;  %1859 = vst [vmem:[%s3128_s12 + $0xd0] sm:$0xff] %v3285_v21 }
 0x1c7   : > { %v799_v12 = vpop.f32.mrf.mxu0 }
 0x1c8   : > { %v877_v30 = vsub.f32 %v3116_v28, %v839_v11  ;;  %v838_v48 = vmul.f32 2.0, %v799_v12  ;;  %1056 = vmin.xlane.f32.xlu1 %v3134_v47  ;;  %1862 = vst [vmem:[%s3128_s12 + $0xe8] sm:$0xff] %v3289_v26  ;;  %v3298_v15 = vadd.f32 %v3094_v8, %v874_v20 }
 0x1ca   : > { %v876_v33 = vsub.f32 %v3116_v28, %v838_v48  ;;  %v3302_v35 = vadd.f32 %v3082_v4, %v877_v30  ;;  %1861 = vst [vmem:[%s3128_s12 + $0xe0] sm:$0xff] %v3298_v15 }
 0x1cc   : > { %v3307_v6 = vadd.f32 %v3078_v3, %v876_v33  ;;  %1054 = vmin.xlane.f32.xlu1 %v3121_v49  ;;  %1102 = vmin.xlane.f32.xlu0 %v3302_v35  ;;  %1864 = vst [vmem:[%s3128_s12 + $0xf8] sm:$0xff] %v3302_v35  ;;  %v4070_v3 = vlaneseq }
 0x1ce   : > { %1863 = vst [vmem:[%s3128_s12 + $0xf0] sm:$0xff] %v3307_v6  ;;  %v3338_v4 = vand.u32 127, %v4070_v3 }
 0x1d0   : > { %1052 = vmin.xlane.f32.xlu1 %v3136_v42  ;;  %1100 = vmin.xlane.f32.xlu0 %v3307_v6  ;;  %4087 = vst [vmem:[#allocation8_spill] sm:$0xff] %v3338_v4 }
 0x1d4   : > { %1050 = vmin.xlane.f32.xlu1 %v3147_v41  ;;  %1098 = vmin.xlane.f32.xlu0 %v3289_v26 }
 0x1d8   : > { %1048 = vmin.xlane.f32.xlu1 %v3160_v2  ;;  %1096 = vmin.xlane.f32.xlu0 %v3298_v15 }
 0x1dc   : > { %1046 = vmin.xlane.f32.xlu1 %v3170_v23  ;;  %1094 = vmin.xlane.f32.xlu0 %v3276_v14 }
 0x1e0   : > { %1044 = vmin.xlane.f32.xlu1 %v3184_v50  ;;  %1092 = vmin.xlane.f32.xlu0 %v3285_v21 }
 0x1e4   : > { %1042 = vmin.xlane.f32.xlu1 %v3194_v58  ;;  %1090 = vmin.xlane.f32.xlu0 %v3263_v60 }
 0x1e8   : > { %1040 = vmin.xlane.f32.xlu1 %v3210_v1  ;;  %1088 = vmin.xlane.f32.xlu0 %v3272_v52 }
 0x1ec   : > { %1086 = vmin.xlane.f32.xlu0 %v3250_v55 }
 0x1f0   : > { %1084 = vmin.xlane.f32.xlu0 %v3259_v62 }
 0x1f4   : > { %1082 = vmin.xlane.f32.xlu0 %v3237_v13 }
 0x1f8   : > { %1080 = vmin.xlane.f32.xlu0 %v3246_v24 }
 0x1fc   : > { %1078 = vmin.xlane.f32.xlu0 %v3225_v22 }
 0x200   : > { %1076 = vmin.xlane.f32.xlu0 %v3233_v31 }
 0x204   : > { %1074 = vmin.xlane.f32.xlu0 %v3214_v34 }
 0x208   : > { %1072 = vmin.xlane.f32.xlu0 %v3222_v16 }
 0x235   : > { %v1071_v8 = vpop.xlane.xlu1 %1070 }
 0x236   : > { %vm1119_vm1 = vcmp.eq.f32.partialorder %v3197_v59, %v1071_v8 }
 0x237   : > { %v3342_v28 = vsel %vm1119_vm1, %v3338_v4, 128 }
 0x238   : > { %v1379_v51 = vshra.s32 %v3342_v28, 16 }
 0x239   : > { %v1069_v46 = vpop.xlane.xlu1 %1068 }
 0x23a   : > { %v3345_v10 = vcvt.s32.f32 %v1379_v51  ;;  %vm1118_vm2 = vcmp.eq.f32.partialorder %v3207_v61, %v1069_v46 }
 0x23b   : > { %v3349_v54 = vsel %vm1118_vm2, %v3338_v4, 128 }
 0x23c   : > { %v1365_v44 = vshra.s32 %v3349_v54, 16  ;;  %1382 = vmin.xlane.f32.xlu1 %v3345_v10 }
 0x23d   : > { %v1067_v45 = vpop.xlane.xlu1 %1066 }
 0x23e   : > { %v3353_v56 = vcvt.s32.f32 %v1365_v44  ;;  %vm1117_vm3 = vcmp.eq.f32.partialorder %v3173_v25, %v1067_v45 }
 0x23f   : > { %v3357_v59 = vsel %vm1117_vm3, %v3338_v4, 128 }
 0x240   : > { %v1351_v57 = vshra.s32 %v3357_v59, 16  ;;  %1368 = vmin.xlane.f32.xlu1 %v3353_v56 }
 0x241   : > { %v1065_v61 = vpop.xlane.xlu1 %1064 }
 0x242   : > { %v3361_v40 = vcvt.s32.f32 %v1351_v57  ;;  %vm1116_vm4 = vcmp.eq.f32.partialorder %v3182_v29, %v1065_v61 }
 0x243   : > { %v3365_v7 = vsel %vm1116_vm4, %v3338_v4, 128 }
 0x244   : > { %v1337_v43 = vshra.s32 %v3365_v7, 16  ;;  %1354 = vmin.xlane.f32.xlu1 %v3361_v40 }
 0x245   : > { %v1063_v25 = vpop.xlane.xlu1 %1062 }
 0x246   : > { %v3369_v27 = vcvt.s32.f32 %v1337_v43  ;;  %vm1115_vm5 = vcmp.eq.f32.partialorder %v3151_v63, %v1063_v25 }
 0x247   : > { %v3373_v38 = vsel %vm1115_vm5, %v3338_v4, 128 }
 0x248   : > { %v1323_v32 = vshra.s32 %v3373_v38, 16  ;;  %1340 = vmin.xlane.f32.xlu1 %v3369_v27 }
 0x249   : > { %v1061_v29 = vpop.xlane.xlu1 %1060 }
 0x24a   : > { %v3377_v36 = vcvt.s32.f32 %v1323_v32  ;;  %vm1114_vm6 = vcmp.eq.f32.partialorder %v3158_v0, %v1061_v29 }
 0x24b   : > { %v3381_v39 = vsel %vm1114_vm6, %v3338_v4, 128 }
 0x24c   : > { %v1309_v37 = vshra.s32 %v3381_v39, 16  ;;  %1326 = vmin.xlane.f32.xlu1 %v3377_v36 }
 0x24d   : > { %v1059_v63 = vpop.xlane.xlu1 %1058 }
 0x24e   : > { %v3385_v18 = vcvt.s32.f32 %v1309_v37  ;;  %vm1113_vm7 = vcmp.eq.f32.partialorder %v3125_v53, %v1059_v63 }
 0x24f   : > { %v3389_v9 = vsel %vm1113_vm7, %v3338_v4, 128 }
 0x250   : > { %v1295_v5 = vshra.s32 %v3389_v9, 16  ;;  %1312 = vmin.xlane.f32.xlu1 %v3385_v18 }
 0x251   : > { %v1057_v0 = vpop.xlane.xlu1 %1056 }
 0x252   : > { %v3393_v19 = vcvt.s32.f32 %v1295_v5  ;;  %vm1112_vm8 = vcmp.eq.f32.partialorder %v3134_v47, %v1057_v0 }
 0x253   : > { %v3397_v17 = vsel %vm1112_vm8, %v3338_v4, 128 }
 0x254   : > { %v1281_v20 = vshra.s32 %v3397_v17, 16  ;;  %1298 = vmin.xlane.f32.xlu1 %v3393_v19 }
 0x255   : > { %v1055_v53 = vpop.xlane.xlu1 %1054  ;;  %v1103_v11 = vpop.xlane.xlu0 %1102 }
 0x256   : > { %v3401_v12 = vcvt.s32.f32 %v1281_v20  ;;  %vm1111_vm9 = vcmp.eq.f32.partialorder %v3121_v49, %v1055_v53  ;;  %vm1135_vm10 = vcmp.eq.f32.partialorder %v3302_v35, %v1103_v11 }
 0x257   : > { %v3406_v30 = vsel %vm1111_vm9, %v3338_v4, 128  ;;  %v3409_v47 = vsel %vm1135_vm10, %v3338_v4, 128 }
 0x258   : > { %v1267_v48 = vshra.s32 %v3406_v30, 16  ;;  %1284 = vmin.xlane.f32.xlu1 %v3401_v12  ;;  %v1603_v33 = vshra.s32 %v3409_v47, 16 }
 0x259   : > { %v1053_v8 = vpop.xlane.xlu1 %1052  ;;  %v1101_v51 = vpop.xlane.xlu0 %1100 }
 0x25a   : > { %v3414_v46 = vcvt.s32.f32 %v1267_v48  ;;  %vm1110_vm11 = vcmp.eq.f32.partialorder %v3136_v42, %v1053_v8  ;;  %vm1134_vm12 = vcmp.eq.f32.partialorder %v3307_v6, %v1101_v51  ;;  %v3421_v35 = vcvt.s32.f32 %v1603_v33 }
 0x25b   : > { %v3418_v49 = vsel %vm1110_vm11, %v3338_v4, 128  ;;  %v3425_v45 = vsel %vm1134_vm12, %v3338_v4, 128 }
 0x25c   : > { %v1253_v44 = vshra.s32 %v3418_v49, 16  ;;  %1270 = vmin.xlane.f32.xlu1 %v3414_v46  ;;  %1606 = vmin.xlane.f32.xlu0 %v3421_v35  ;;  %v1589_v42 = vshra.s32 %v3425_v45, 16 }
 0x25d   : > { %v1051_v57 = vpop.xlane.xlu1 %1050  ;;  %v1099_v61 = vpop.xlane.xlu0 %1098 }
 0x25e   : > { %v3430_v43 = vcvt.s32.f32 %v1253_v44  ;;  %vm1109_vm13 = vcmp.eq.f32.partialorder %v3147_v41, %v1051_v57  ;;  %vm1133_vm14 = vcmp.eq.f32.partialorder %v3289_v26, %v1099_v61  ;;  %v3440_v32 = vcvt.s32.f32 %v1589_v42 }
 0x25f   : > { %v3435_v6 = vsel %vm1109_vm13, %v3338_v4, 128  ;;  %v3438_v25 = vsel %vm1133_vm14, %v3338_v4, 128 }
 0x260   : > { %v1239_v29 = vshra.s32 %v3435_v6, 16  ;;  %v1575_v37 = vshra.s32 %v3438_v25, 16  ;;  %1256 = vmin.xlane.f32.xlu1 %v3430_v43  ;;  %1592 = vmin.xlane.f32.xlu0 %v3440_v32 }
 0x261   : > { %v1049_v63 = vpop.xlane.xlu1 %1048  ;;  %v1097_v41 = vpop.xlane.xlu0 %1096 }
 0x262   : > { %v3446_v5 = vcvt.s32.f32 %v1239_v29  ;;  %v3448_v26 = vcvt.s32.f32 %v1575_v37  ;;  %vm1108_vm15 = vcmp.eq.f32.partialorder %v3160_v2, %v1049_v63  ;;  %vm1132_vm0 = vcmp.eq.f32.partialorder %v3298_v15, %v1097_v41 }
 0x263   : > { %v3453_v0 = vsel %vm1108_vm15, %v3338_v4, 128  ;;  %v3456_v20 = vsel %vm1132_vm0, %v3338_v4, 128 }
 0x264   : > { %1242 = vmin.xlane.f32.xlu1 %v3446_v5  ;;  %v1225_v53 = vshra.s32 %v3453_v0, 16  ;;  %v1561_v11 = vshra.s32 %v3456_v20, 16  ;;  %1578 = vmin.xlane.f32.xlu0 %v3448_v26 }
 0x265   : > { %v1047_v48 = vpop.xlane.xlu1 %1046  ;;  %v1095_v33 = vpop.xlane.xlu0 %1094 }
 0x266   : > { %vm1107_vm1 = vcmp.eq.f32.partialorder %v3170_v23, %v1047_v48  ;;  %vm1131_vm2 = vcmp.eq.f32.partialorder %v3276_v14, %v1095_v33  ;;  %v3464_v2 = vcvt.s32.f32 %v1225_v53  ;;  %v3466_v15 = vcvt.s32.f32 %v1561_v11 }
 0x267   : > { %v3469_v8 = vsel %vm1107_vm1, %v3338_v4, 128  ;;  %v3472_v51 = vsel %vm1131_vm2, %v3338_v4, 128 }
 0x268   : > { %v1211_v44 = vshra.s32 %v3469_v8, 16  ;;  %v1547_v57 = vshra.s32 %v3472_v51, 16  ;;  %1228 = vmin.xlane.f32.xlu1 %v3464_v2  ;;  %1564 = vmin.xlane.f32.xlu0 %v3466_v15 }
 0x269   : > { %v1045_v23 = vpop.xlane.xlu1 %1044  ;;  %v1093_v14 = vpop.xlane.xlu0 %1092 }
 0x26a   : > { %vm1106_vm3 = vcmp.eq.f32.partialorder %v3184_v50, %v1045_v23  ;;  %vm1130_vm4 = vcmp.eq.f32.partialorder %v3285_v21, %v1093_v14  ;;  %v3480_v61 = vcvt.s32.f32 %v1211_v44  ;;  %v3482_v42 = vcvt.s32.f32 %v1547_v57 }
 0x26b   : > { %v3485_v29 = vsel %vm1106_vm3, %v3338_v4, 128  ;;  %v3488_v37 = vsel %vm1130_vm4, %v3338_v4, 128 }
 0x26c   : > { %v1197_v63 = vshra.s32 %v3485_v29, 16  ;;  %v1533_v41 = vshra.s32 %v3488_v37, 16  ;;  %1214 = vmin.xlane.f32.xlu1 %v3480_v61  ;;  %1550 = vmin.xlane.f32.xlu0 %v3482_v42 }
 0x26d   : > { %v1043_v50 = vpop.xlane.xlu1 %1042  ;;  %v1091_v21 = vpop.xlane.xlu0 %1090 }
 0x26e   : > { %vm1105_vm5 = vcmp.eq.f32.partialorder %v3194_v58, %v1043_v50  ;;  %vm1129_vm6 = vcmp.eq.f32.partialorder %v3263_v60, %v1091_v21  ;;  %v3496_v53 = vcvt.s32.f32 %v1197_v63  ;;  %v3498_v11 = vcvt.s32.f32 %v1533_v41 }
 0x26f   : > { %v3501_v48 = vsel %vm1105_vm5, %v3338_v4, 128  ;;  %v3504_v33 = vsel %vm1129_vm6, %v3338_v4, 128 }
 0x270   : > { %v1183_v44 = vshra.s32 %v3501_v48, 16  ;;  %v1519_v57 = vshra.s32 %v3504_v33, 16  ;;  %1200 = vmin.xlane.f32.xlu1 %v3496_v53  ;;  %1536 = vmin.xlane.f32.xlu0 %v3498_v11 }
 0x271   : > { %v1041_v58 = vpop.xlane.xlu1 %1040  ;;  %v1089_v60 = vpop.xlane.xlu0 %1088 }
 0x272   : > { %vm1104_vm7 = vcmp.eq.f32.partialorder %v3210_v1, %v1041_v58  ;;  %vm1128_vm8 = vcmp.eq.f32.partialorder %v3272_v52, %v1089_v60  ;;  %v3512_v23 = vcvt.s32.f32 %v1183_v44  ;;  %v3514_v14 = vcvt.s32.f32 %v1519_v57 }
 0x273   : > { %v3517_v63 = vsel %vm1104_vm7, %v3338_v4, 128  ;;  %v3520_v41 = vsel %vm1128_vm8, %v3338_v4, 128 }
 0x274   : > { %v1169_v50 = vshra.s32 %v3517_v63, 16  ;;  %v1505_v21 = vshra.s32 %v3520_v41, 16  ;;  %1186 = vmin.xlane.f32.xlu1 %v3512_v23  ;;  %1522 = vmin.xlane.f32.xlu0 %v3514_v14 }
 0x275   : > { %v1087_v1 = vpop.xlane.xlu0 %1086 }
 0x276   : > { %vm1127_vm9 = vcmp.eq.f32.partialorder %v3250_v55, %v1087_v1  ;;  %v3527_v52 = vcvt.s32.f32 %v1169_v50  ;;  %v3529_v44 = vcvt.s32.f32 %v1505_v21 }
 0x277   : > { %v3532_v57 = vsel %vm1127_vm9, %v3338_v4, 128 }
 0x278   : > { %4088 = vst [vmem:[#allocation9_spill] sm:$0xff] %v3527_v52  ;;  %4089 = vst [vmem:[#allocation10_spill] sm:$0xff] %v3529_v44  ;;  %v1491_v58 = vshra.s32 %v3532_v57, 16  ;;  %1172 = vmin.xlane.f32.xlu1 %v3527_v52  ;;  %1508 = vmin.xlane.f32.xlu0 %v3529_v44 }
 0x279   : > { %v1085_v60 = vpop.xlane.xlu0 %1084 }
 0x27a   : > { %vm1126_vm10 = vcmp.eq.f32.partialorder %v3259_v62, %v1085_v60  ;;  %v3538_v3 = vcvt.s32.f32 %v1491_v58 }
 0x27b   : > { %v3541_v55 = vsel %vm1126_vm10, %v3338_v4, 128 }
 0x27c   : > { %v1477_v50 = vshra.s32 %v3541_v55, 16  ;;  %1494 = vmin.xlane.f32.xlu0 %v3538_v3 }
 0x27d   : > { %v1083_v21 = vpop.xlane.xlu0 %1082 }
 0x27e   : > { %v3545_v1 = vcvt.s32.f32 %v1477_v50  ;;  %vm1125_vm11 = vcmp.eq.f32.partialorder %v3237_v13, %v1083_v21 }
 0x27f   : > { %v3549_v52 = vsel %vm1125_vm11, %v3338_v4, 128 }
 0x280   : > { %4090 = vst [vmem:[#allocation11_spill] sm:$0xff] %v3549_v52  ;;  %v1463_v44 = vshra.s32 %v3549_v52, 16  ;;  %1480 = vmin.xlane.f32.xlu0 %v3545_v1 }
 0x281   : > { %v1081_v62 = vpop.xlane.xlu0 %1080 }
 0x282   : > { %v3553_v58 = vcvt.s32.f32 %v1463_v44  ;;  %vm1124_vm12 = vcmp.eq.f32.partialorder %v3246_v24, %v1081_v62 }
 0x283   : > { %v3557_v60 = vsel %vm1124_vm12, %v3338_v4, 128 }
 0x284   : > { %4091 = vst [vmem:[#allocation12_spill] sm:$0xff] %v3557_v60  ;;  %v1449_v50 = vshra.s32 %v3557_v60, 16  ;;  %1466 = vmin.xlane.f32.xlu0 %v3553_v58 }
 0x285   : > { %v1079_v13 = vpop.xlane.xlu0 %1078 }
 0x286   : > { %v3561_v21 = vcvt.s32.f32 %v1449_v50  ;;  %vm1123_vm13 = vcmp.eq.f32.partialorder %v3225_v22, %v1079_v13 }
 0x287   : > { %v3565_v52 = vsel %vm1123_vm13, %v3338_v4, 128 }
 0x288   : > { %4092 = vst [vmem:[#allocation13_spill] sm:$0xff] %v3565_v52  ;;  %v1435_v44 = vshra.s32 %v3565_v52, 16  ;;  %1452 = vmin.xlane.f32.xlu0 %v3561_v21 }
 0x289   : > { %v1077_v24 = vpop.xlane.xlu0 %1076 }
 0x28a   : > { %v3569_v62 = vcvt.s32.f32 %v1435_v44  ;;  %vm1122_vm14 = vcmp.eq.f32.partialorder %v3233_v31, %v1077_v24 }
 0x28b   : > { %v3573_v60 = vsel %vm1122_vm14, %v3338_v4, 128 }
 0x28c   : > { %4093 = vst [vmem:[#allocation14_spill] sm:$0xff] %v3573_v60  ;;  %v1421_v50 = vshra.s32 %v3573_v60, 16  ;;  %1438 = vmin.xlane.f32.xlu0 %v3569_v62 }
 0x28d   : > { %v1075_v22 = vpop.xlane.xlu0 %1074 }
 0x28e   : > { %v3577_v13 = vcvt.s32.f32 %v1421_v50  ;;  %vm1121_vm15 = vcmp.eq.f32.partialorder %v3214_v34, %v1075_v22  ;;  %v1378_v22 = vand.u32 65535, %v3342_v28 }
 0x28f   : > { %v3581_v52 = vsel %vm1121_vm15, %v3338_v4, 128 }
 0x290   : > { %4094 = vst [vmem:[#allocation15_spill] sm:$0xff] %v3577_v13  ;;  %4095 = vst [vmem:[#allocation16_spill] sm:$0xff] %v3581_v52  ;;  %v1407_v44 = vshra.s32 %v3581_v52, 16  ;;  %1424 = vmin.xlane.f32.xlu0 %v3577_v13  ;;  %v1380_v52 = vcvt.s32.f32 %v1378_v22  ;;  %v1364_v13 = vand.u32 65535, %v3349_v54  ;;  %v1336_v54 = vand.u32 65535, %v3365_v7 }
 0x291   : > { %v1073_v31 = vpop.xlane.xlu0 %1072  ;;  %v1308_v7 = vand.u32 65535, %v3381_v39  ;;  %v1280_v39 = vand.u32 65535, %v3397_v17 }
 0x292   : > { %v3585_v24 = vcvt.s32.f32 %v1407_v44  ;;  %vm1120_vm0 = vcmp.eq.f32.partialorder %v3222_v16, %v1073_v31  ;;  %v1366_v31 = vcvt.s32.f32 %v1364_v13 }
 0x293   : > { %v3589_v60 = vsel %vm1120_vm0, %v3338_v4, 128  ;;  %v1350_v4 = vand.u32 65535, %v3357_v59  ;;  %v1322_v59 = vand.u32 65535, %v3373_v38  ;;  %v1294_v38 = vand.u32 65535, %v3389_v9 }
 0x294   : > { %4096 = vst [vmem:[#allocation17_spill] sm:$0xff] %v3585_v24  ;;  %v1393_v50 = vshra.s32 %v3589_v60, 16  ;;  %1410 = vmin.xlane.f32.xlu0 %v3585_v24  ;;  %v1266_v9 = vand.u32 65535, %v3406_v30 }
 0x295   : > { %v1352_v28 = vcvt.s32.f32 %v1350_v4  ;;  %v1324_v4 = vcvt.s32.f32 %v1322_v59  ;;  %v1602_v59 = vand.u32 65535, %v3409_v47 }
 0x296   : > { %v3593_v34 = vcvt.s32.f32 %v1393_v50  ;;  %v1268_v17 = vcvt.s32.f32 %v1266_v9 }
 0x298   : > { %1396 = vmin.xlane.f32.xlu0 %v3593_v34 }
 0x2c5   : > { %v3598_v44 = vpop.xlane.xlu1 %1382 }
 0x2c6   : > { %vm1384_vm1 = vcmp.eq.f32.partialorder %v3345_v10, %v3598_v44 }
 0x2c7   : > { %v1385_v16 = vsel %vm1384_vm1, %v1380_v52, inf  ;;  %v1338_v52 = vcvt.s32.f32 %v1336_v54 }
 0x2c8   : > { %1386 = vmin.xlane.f32.xlu1 %v1385_v16 }
 0x2c9   : > { %v3603_v24 = vpop.xlane.xlu1 %1368 }
 0x2ca   : > { %vm1370_vm2 = vcmp.eq.f32.partialorder %v3353_v56, %v3603_v24 }
 0x2cb   : > { %v1371_v50 = vsel %vm1370_vm2, %v1366_v31, inf  ;;  %v1310_v31 = vcvt.s32.f32 %v1308_v7  ;;  %v1588_v7 = vand.u32 65535, %v3425_v45  ;;  %v1574_v45 = vand.u32 65535, %v3438_v25 }
 0x2cc   : > { %1372 = vmin.xlane.f32.xlu1 %v1371_v50  ;;  %v1560_v25 = vand.u32 65535, %v3456_v20 }
 0x2cd   : > { %v3608_v22 = vpop.xlane.xlu1 %1354 }
 0x2ce   : > { %vm1356_vm3 = vcmp.eq.f32.partialorder %v3361_v40, %v3608_v22 }
 0x2cf   : > { %v1357_v10 = vsel %vm1356_vm3, %v1352_v28, inf  ;;  %v1296_v28 = vcvt.s32.f32 %v1294_v38  ;;  %v1590_v38 = vcvt.s32.f32 %v1588_v7 }
 0x2d0   : > { %1358 = vmin.xlane.f32.xlu1 %v1357_v10  ;;  %v1282_v10 = vcvt.s32.f32 %v1280_v39  ;;  %v1576_v39 = vcvt.s32.f32 %v1574_v45 }
 0x2d1   : > { %v3613_v13 = vpop.xlane.xlu1 %1340 }
 0x2d2   : > { %vm1342_vm4 = vcmp.eq.f32.partialorder %v3369_v27, %v3613_v13 }
 0x2d3   : > { %v1343_v56 = vsel %vm1342_vm4, %v1338_v52, inf }
 0x2d4   : > { %1344 = vmin.xlane.f32.xlu1 %v1343_v56  ;;  %v1252_v56 = vand.u32 65535, %v3418_v49 }
 0x2d5   : > { %v3618_v16 = vpop.xlane.xlu1 %1326 }
 0x2d6   : > { %vm1328_vm5 = vcmp.eq.f32.partialorder %v3377_v36, %v3618_v16 }
 0x2d7   : > { %v1329_v40 = vsel %vm1328_vm5, %v1324_v4, inf }
 0x2d8   : > { %1330 = vmin.xlane.f32.xlu1 %v1329_v40  ;;  %v1254_v40 = vcvt.s32.f32 %v1252_v56 }
 0x2d9   : > { %v3623_v50 = vpop.xlane.xlu1 %1312 }
 0x2da   : > { %vm1314_vm6 = vcmp.eq.f32.partialorder %v3385_v18, %v3623_v50 }
 0x2db   : > { %v1315_v27 = vsel %vm1314_vm6, %v1310_v31, inf  ;;  %v1238_v31 = vand.u32 65535, %v3435_v6 }
 0x2dc   : > { %1316 = vmin.xlane.f32.xlu1 %v1315_v27 }
 0x2dd   : > { %v3628_v54 = vpop.xlane.xlu1 %1298 }
 0x2de   : > { %vm1300_vm7 = vcmp.eq.f32.partialorder %v3393_v19, %v3628_v54  ;;  %v1604_v19 = vcvt.s32.f32 %v1602_v59  ;;  %v1562_v59 = vcvt.s32.f32 %v1560_v25 }
 0x2df   : > { %v1301_v36 = vsel %vm1300_vm7, %v1296_v28, inf  ;;  %v1240_v28 = vcvt.s32.f32 %v1238_v31 }
 0x2e0   : > { %1302 = vmin.xlane.f32.xlu1 %v1301_v36  ;;  %v1224_v36 = vand.u32 65535, %v3453_v0  ;;  %v1546_v0 = vand.u32 65535, %v3472_v51  ;;  %v1532_v51 = vand.u32 65535, %v3488_v37  ;;  %v1518_v37 = vand.u32 65535, %v3504_v33 }
 0x2e1   : > { %v3633_v52 = vpop.xlane.xlu1 %1284  ;;  %v1504_v33 = vand.u32 65535, %v3520_v41 }
 0x2e2   : > { %vm1286_vm8 = vcmp.eq.f32.partialorder %v3401_v12, %v3633_v52  ;;  %v1226_v9 = vcvt.s32.f32 %v1224_v36 }
 0x2e3   : > { %v1287_v18 = vsel %vm1286_vm8, %v1282_v10, inf  ;;  %v1506_v36 = vcvt.s32.f32 %v1504_v33 }
 0x2e4   : > { %1288 = vmin.xlane.f32.xlu1 %v1287_v18  ;;  %v1210_v18 = vand.u32 65535, %v3469_v8  ;;  %v1196_v8 = vand.u32 65535, %v3485_v29  ;;  %v1182_v29 = vand.u32 65535, %v3501_v48  ;;  %v1168_v48 = vand.u32 65535, %v3517_v63 }
 0x2e5   : > { %v3639_v4 = vpop.xlane.xlu1 %1270  ;;  %v3644_v30 = vpop.xlane.xlu0 %1606  ;;  %v1490_v63 = vand.u32 65535, %v3532_v57 }
 0x2e6   : > { %vm1272_vm9 = vcmp.eq.f32.partialorder %v3414_v46, %v3639_v4  ;;  %vm1608_vm10 = vcmp.eq.f32.partialorder %v3421_v35, %v3644_v30  ;;  %v1212_v56 = vcvt.s32.f32 %v1210_v18  ;;  %v1184_v45 = vcvt.s32.f32 %v1182_v29 }
 0x2e7   : > { %v1273_v47 = vsel %vm1272_vm9, %v1268_v17, inf  ;;  %v1609_v12 = vsel %vm1608_vm10, %v1604_v19, inf  ;;  %v1548_v19 = vcvt.s32.f32 %v1546_v0 }
 0x2e8   : > { %1274 = vmin.xlane.f32.xlu1 %v1273_v47  ;;  %1610 = vmin.xlane.f32.xlu0 %v1609_v12  ;;  %v1198_v12 = vcvt.s32.f32 %v1196_v8 }
 0x2e9   : > { %v3649_v49 = vpop.xlane.xlu1 %1256  ;;  %v3654_v46 = vpop.xlane.xlu0 %1592 }
 0x2ea   : > { %vm1258_vm11 = vcmp.eq.f32.partialorder %v3430_v43, %v3649_v49  ;;  %vm1594_vm12 = vcmp.eq.f32.partialorder %v3440_v32, %v3654_v46 }
 0x2eb   : > { %v1259_v35 = vsel %vm1258_vm11, %v1254_v40, inf  ;;  %v1595_v27 = vsel %vm1594_vm12, %v1590_v38, inf  ;;  %v1534_v40 = vcvt.s32.f32 %v1532_v51  ;;  %v4100_v51 = vld [vmem:[#allocation12_spill] sm:$0xff] }
 0x2ec   : > { %1260 = vmin.xlane.f32.xlu1 %v1259_v35  ;;  %1596 = vmin.xlane.f32.xlu0 %v1595_v27  ;;  %v1520_v35 = vcvt.s32.f32 %v1518_v37 }
 0x2ed   : > { %v3658_v6 = vpop.xlane.xlu1 %1242  ;;  %v3664_v43 = vpop.xlane.xlu0 %1578 }
 0x2ee   : > { %vm1244_vm13 = vcmp.eq.f32.partialorder %v3446_v5, %v3658_v6  ;;  %vm1580_vm14 = vcmp.eq.f32.partialorder %v3448_v26, %v3664_v43 }
 0x2ef   : > { %v1245_v32 = vsel %vm1244_vm13, %v1240_v28, inf  ;;  %v1581_v10 = vsel %vm1580_vm14, %v1576_v39, inf  ;;  %v1170_v39 = vcvt.s32.f32 %v1168_v48  ;;  %v4103_v48 = vld [vmem:[#allocation16_spill] sm:$0xff] }
 0x2f0   : > { %1246 = vmin.xlane.f32.xlu1 %v1245_v32  ;;  %1582 = vmin.xlane.f32.xlu0 %v1581_v10  ;;  %v4097_v32 = vld [vmem:[#allocation9_spill] sm:$0xff]  ;;  %v1406_v33 = vand.u32 65535, %v4103_v48 }
 0x2f1   : > { %v3670_v17 = vpop.xlane.xlu1 %1228  ;;  %v3672_v20 = vpop.xlane.xlu0 %1564 }
 0x2f2   : > { %vm1230_vm15 = vcmp.eq.f32.partialorder %v3464_v2, %v3670_v17  ;;  %vm1566_vm0 = vcmp.eq.f32.partialorder %v3466_v15, %v3672_v20 }
 0x2f3   : > { %v1231_v5 = vsel %vm1230_vm15, %v1226_v9, inf  ;;  %v1567_v26 = vsel %vm1566_vm0, %v1562_v59, inf  ;;  %v1492_v9 = vcvt.s32.f32 %v1490_v63  ;;  %v1476_v59 = vand.u32 65535, %v3541_v55 }
 0x2f4   : > { %1232 = vmin.xlane.f32.xlu1 %v1231_v5  ;;  %1568 = vmin.xlane.f32.xlu0 %v1567_v26  ;;  %v4099_v5 = vld [vmem:[#allocation11_spill] sm:$0xff]  ;;  %v1448_v55 = vand.u32 65535, %v4100_v51  ;;  %v1613_v51 = vcvt.f32.s32 %v3644_v30  ;;  %v1361_v30 = vcvt.f32.s32 %v3608_v22 }
 0x2f5   : > { %v3680_v7 = vpop.xlane.xlu1 %1214  ;;  %v3682_v47 = vpop.xlane.xlu0 %1550  ;;  %v1478_v0 = vcvt.s32.f32 %v1476_v59  ;;  %v1462_v26 = vand.u32 65535, %v4099_v5 }
 0x2f6   : > { %vm1216_vm1 = vcmp.eq.f32.partialorder %v3480_v61, %v3680_v7  ;;  %vm1552_vm2 = vcmp.eq.f32.partialorder %v3482_v42, %v3682_v47 }
 0x2f7   : > { %v1217_v2 = vsel %vm1216_vm1, %v1212_v56, inf  ;;  %v1553_v15 = vsel %vm1552_vm2, %v1548_v19, inf  ;;  %v1464_v8 = vcvt.s32.f32 %v1462_v26 }
 0x2f8   : > { %1218 = vmin.xlane.f32.xlu1 %v1217_v2  ;;  %1554 = vmin.xlane.f32.xlu0 %v1553_v15  ;;  %v1450_v15 = vcvt.s32.f32 %v1448_v55 }
 0x2f9   : > { %v3690_v31 = vpop.xlane.xlu1 %1200  ;;  %v3692_v38 = vpop.xlane.xlu0 %1536 }
 0x2fa   : > { %vm1202_vm3 = vcmp.eq.f32.partialorder %v3496_v53, %v3690_v31  ;;  %vm1538_vm4 = vcmp.eq.f32.partialorder %v3498_v11, %v3692_v38 }
 0x2fb   : > { %v1203_v61 = vsel %vm1202_vm3, %v1198_v12, inf  ;;  %v1539_v42 = vsel %vm1538_vm4, %v1534_v40, inf  ;;  %v4101_v12 = vld [vmem:[#allocation13_spill] sm:$0xff] }
 0x2fc   : > { %1204 = vmin.xlane.f32.xlu1 %v1203_v61  ;;  %1540 = vmin.xlane.f32.xlu0 %v1539_v42  ;;  %v1434_v40 = vand.u32 65535, %v4101_v12  ;;  %v4102_v61 = vld [vmem:[#allocation14_spill] sm:$0xff]  ;;  %v1375_v12 = vcvt.f32.s32 %v3603_v24 }
 0x2fd   : > { %v3700_v27 = vpop.xlane.xlu1 %1186  ;;  %v3702_v28 = vpop.xlane.xlu0 %1522  ;;  %v1420_v42 = vand.u32 65535, %v4102_v61 }
 0x2fe   : > { %vm1188_vm5 = vcmp.eq.f32.partialorder %v3512_v23, %v3700_v27  ;;  %vm1524_vm6 = vcmp.eq.f32.partialorder %v3514_v14, %v3702_v28  ;;  %v4098_v23 = vld [vmem:[#allocation10_spill] sm:$0xff]  ;;  %v1436_v37 = vcvt.s32.f32 %v1434_v40 }
 0x2ff   : > { %v1189_v53 = vsel %vm1188_vm5, %v1184_v45, inf  ;;  %v1525_v11 = vsel %vm1524_vm6, %v1520_v35, inf  ;;  %v1422_v35 = vcvt.s32.f32 %v1420_v42 }
 0x300   : > { %1190 = vmin.xlane.f32.xlu1 %v1189_v53  ;;  %1526 = vmin.xlane.f32.xlu0 %v1525_v11  ;;  %v4104_v11 = vld [vmem:[#allocation15_spill] sm:$0xff] }
 0x301   : > { %v3709_v25 = vpop.xlane.xlu1 %1172  ;;  %v3711_v41 = vpop.xlane.xlu0 %1508 }
 0x302   : > { %vm1174_vm7 = vcmp.eq.f32.partialorder %v4097_v32, %v3709_v25  ;;  %vm1510_vm8 = vcmp.eq.f32.partialorder %v4098_v23, %v3711_v41  ;;  %v4105_v32 = vld [vmem:[#allocation17_spill] sm:$0xff] }
 0x303   : > { %v1175_v10 = vsel %vm1174_vm7, %v1170_v39, inf  ;;  %v1511_v14 = vsel %vm1510_vm8, %v1506_v36, inf  ;;  %v1408_v39 = vcvt.s32.f32 %v1406_v33  ;;  %v1392_v36 = vand.u32 65535, %v3589_v60 }
 0x304   : > { %1176 = vmin.xlane.f32.xlu1 %v1175_v10  ;;  %1512 = vmin.xlane.f32.xlu0 %v1511_v14 }
 0x305   : > { %v3718_v18 = vpop.xlane.xlu0 %1494  ;;  %v1394_v23 = vcvt.s32.f32 %v1392_v36 }
 0x306   : > { %vm1496_vm9 = vcmp.eq.f32.partialorder %v3538_v3, %v3718_v18 }
 0x307   : > { %v1497_v57 = vsel %vm1496_vm9, %v1492_v9, inf  ;;  %v3756_v9 = vld [vmem:[#allocation2] sm:$0xff] }
 0x308   : > { %1498 = vmin.xlane.f32.xlu0 %v1497_v57  ;;  %2380 = vmatprep.mubr.f32.mxu1 %v3756_v9 }
 0x309   : > { %v3723_v56 = vpop.xlane.xlu0 %1480 }
 0x30a   : > { %vm1482_vm10 = vcmp.eq.f32.partialorder %v3545_v1, %v3723_v56 }
 0x30b   : > { %v1483_v19 = vsel %vm1482_vm10, %v1478_v0, inf }
 0x30c   : > { %1484 = vmin.xlane.f32.xlu0 %v1483_v19 }
 0x30d   : > { %v3728_v2 = vpop.xlane.xlu0 %1466 }
 0x30e   : > { %vm1468_vm11 = vcmp.eq.f32.partialorder %v3553_v58, %v3728_v2 }
 0x30f   : > { %v1469_v3 = vsel %vm1468_vm11, %v1464_v8, inf }
 0x310   : > { %1470 = vmin.xlane.f32.xlu0 %v1469_v3 }
 0x311   : > { %v3733_v29 = vpop.xlane.xlu0 %1452 }
 0x312   : > { %vm1454_vm12 = vcmp.eq.f32.partialorder %v3561_v21, %v3733_v29 }
 0x313   : > { %v1455_v1 = vsel %vm1454_vm12, %v1450_v15, inf }
 0x314   : > { %1456 = vmin.xlane.f32.xlu0 %v1455_v1  ;;  %v1614_v1 = vshll.u32 %v1613_v51, 16 }
 0x315   : > { %v3738_v45 = vpop.xlane.xlu0 %1438 }
 0x316   : > { %vm1440_vm13 = vcmp.eq.f32.partialorder %v3569_v62, %v3738_v45 }
 0x317   : > { %v1441_v58 = vsel %vm1440_vm13, %v1436_v37, inf  ;;  %v1599_v37 = vcvt.f32.s32 %v3654_v46 }
 0x318   : > { %1442 = vmin.xlane.f32.xlu0 %v1441_v58 }
 0x319   : > { %v3743_v53 = vpop.xlane.xlu0 %1424 }
 0x31a   : > { %vm1426_vm14 = vcmp.eq.f32.partialorder %v4104_v11, %v3743_v53  ;;  %v1600_v11 = vshll.u32 %v1599_v37, 16 }
 0x31b   : > { %v1427_v21 = vsel %vm1426_vm14, %v1422_v35, inf }
 0x31c   : > { %1428 = vmin.xlane.f32.xlu0 %v1427_v21  ;;  %v1585_v21 = vcvt.f32.s32 %v3664_v43  ;;  %v1362_v43 = vshll.u32 %v1361_v30, 16 }
 0x31d   : > { %v3748_v63 = vpop.xlane.xlu0 %1410 }
 0x31e   : > { %vm1412_vm15 = vcmp.eq.f32.partialorder %v4105_v32, %v3748_v63  ;;  %v2660_v32 = vmov 1.0  }
 0x31f   : > { %v1413_v62 = vsel %vm1412_vm15, %v1408_v39, inf  ;;  %v4106_v39 = vld [vmem:[#allocation8_spill] sm:$0xff] }
 0x320   : > { %1414 = vmin.xlane.f32.xlu0 %v1413_v62 }
 0x321   : > { %v3752_v10 = vpop.xlane.xlu0 %1396 }
 0x322   : > { %vm1398_vm0 = vcmp.eq.f32.partialorder %v3593_v34, %v3752_v10  ;;  %v1389_v34 = vcvt.f32.s32 %v3598_v44  ;;  %v1376_v44 = vshll.u32 %v1375_v12, 16 }
 0x323   : > { %v1399_v14 = vsel %vm1398_vm0, %v1394_v23, inf  ;;  %v1347_v23 = vcvt.f32.s32 %v3613_v13 }
 0x324   : > { %1400 = vmin.xlane.f32.xlu0 %v1399_v14  ;;  %v1390_v15 = vshll.u32 %v1389_v34, 16 }
 0x325   : > { %v1348_v13 = vshll.u32 %v1347_v23, 16 }
 0x351   : > { %v1387_v60 = vpop.xlane.xlu1 %1386 }
 0x352   : > { %v1388_v55 = vcvt.f32.s32 %v1387_v60  ;;  %v1586_v60 = vshll.u32 %v1585_v21, 16 }
 0x354   : > { %v3773_v42 = vadd.s32 %v1390_v15, %v1388_v55  ;;  %v1333_v15 = vcvt.f32.s32 %v3618_v16 }
 0x355   : > { %v1373_v59 = vpop.xlane.xlu1 %1372 }
 0x356   : > { %v1374_v58 = vcvt.f32.s32 %v1373_v59  ;;  %vm1631_vm2 = vcmp.eq.s32.totalorder %v4106_v39, %v3773_v42  ;;  %v1571_v59 = vcvt.f32.s32 %v3672_v20 }
 0x358   : > { %v3783_v46 = vadd.s32 %v1376_v44, %v1374_v58  ;;  %v1334_v58 = vshll.u32 %v1333_v15, 16  ;;  %v1515_v15 = vcvt.f32.s32 %v3711_v41  ;;  %v1277_v41 = vcvt.f32.s32 %v3639_v4 }
 0x359   : > { %v1359_v57 = vpop.xlane.xlu1 %1358 }
 0x35a   : > { %v1360_v36 = vcvt.f32.s32 %v1359_v57  ;;  %vm1630_vm4 = vcmp.eq.s32.totalorder %v4106_v39, %v3783_v46 }
 0x35c   : > { %v3797_v34 = vadd.s32 %v1362_v43, %v1360_v36 }
 0x35d   : > { %v1345_v0 = vpop.xlane.xlu1 %1344 }
 0x35e   : > { %v1346_v51 = vcvt.f32.s32 %v1345_v0  ;;  %vm1629_vm6 = vcmp.eq.s32.totalorder %v4106_v39, %v3797_v34 }
 0x360   : > { %v3811_v0 = vadd.s32 %v1348_v13, %v1346_v51  ;;  %v1179_v13 = vcvt.f32.s32 %v3709_v25 }
 0x361   : > { %v3759_v5 = vpop.xlane.xlu1 %1330 }
 0x362   : > { %vm1628_vm8 = vcmp.eq.s32.totalorder %v4106_v39, %v3811_v0 }
 0x365   : > { %v3761_v26 = vpop.xlane.xlu1 %1316 }
 0x369   : > { %v3763_v19 = vpop.xlane.xlu1 %1302 }
 0x36d   : > { %v3765_v8 = vpop.xlane.xlu1 %1288 }
 0x371   : > { %v3769_v3 = vpop.xlane.xlu1 %1274  ;;  %v1611_v40 = vpop.xlane.xlu0 %1610 }
 0x372   : > { %v1612_v61 = vcvt.f32.s32 %v1611_v40  ;;  %v1572_v40 = vshll.u32 %v1571_v59, 16 }
 0x374   : > { %v3777_v48 = vadd.s32 %v1614_v1, %v1612_v61  ;;  %v1557_v1 = vcvt.f32.s32 %v3682_v47  ;;  %v1332_v61 = vcvt.f32.s32 %v3759_v5  ;;  %v1319_v47 = vcvt.f32.s32 %v3623_v50 }
 0x375   : > { %v3775_v35 = vpop.xlane.xlu1 %1260  ;;  %v1597_v33 = vpop.xlane.xlu0 %1596 }
 0x376   : > { %v1598_v24 = vcvt.f32.s32 %v1597_v33  ;;  %vm1647_vm1 = vcmp.eq.s32.totalorder %v4106_v39, %v3777_v48  ;;  %v1558_v33 = vshll.u32 %v1557_v1, 16  ;;  %v3826_v5 = vadd.s32 %v1334_v58, %v1332_v61 }
 0x377   : > { %2348 = vmatprep.subr.msk.mxu1 %vm1647_vm1, %v2660_v32  ;;  %v1320_v36 = vshll.u32 %v1319_v47, 16  ;;  %v1193_v58 = vcvt.f32.s32 %v3700_v27  ;;  %v1180_v47 = vshll.u32 %v1179_v13, 16 }
 0x378   : > { %v3788_v62 = vadd.s32 %v1600_v11, %v1598_v24  ;;  %2349 = vmatpush3.xpose.msk.msra.mxu1 %vm1631_vm2, %v2660_v32  ;;  %v1543_v11 = vcvt.f32.s32 %v3692_v38  ;;  %v1318_v24 = vcvt.f32.s32 %v3761_v26  ;;  %v1305_v38 = vcvt.f32.s32 %v3628_v54 }
 0x379   : > { %v3791_v22 = vpop.xlane.xlu1 %1246  ;;  %v1583_v14 = vpop.xlane.xlu0 %1582  ;;  %vm1627_vm10 = vcmp.eq.s32.totalorder %v4106_v39, %v3826_v5  ;;  %v1291_v54 = vcvt.f32.s32 %v3633_v52  ;;  %v1290_v52 = vcvt.f32.s32 %v3765_v8  ;;  %v1501_v8 = vcvt.f32.s32 %v3718_v18 }
 0x37a   : > { %v1584_v57 = vcvt.f32.s32 %v1583_v14  ;;  %vm1646_vm3 = vcmp.eq.s32.totalorder %v4106_v39, %v3788_v62  ;;  %v1544_v14 = vshll.u32 %v1543_v11, 16  ;;  %v3841_v26 = vadd.s32 %v1320_v36, %v1318_v24 }
 0x37b   : > { %2350 = vmatprep.subr.msk.mxu1 %vm1646_vm3, %v2660_v32  ;;  %v1292_v61 = vshll.u32 %v1291_v54, 16  ;;  %v1278_v18 = vshll.u32 %v1277_v41, 16  ;;  %v1487_v54 = vcvt.f32.s32 %v3723_v56 }
 0x37c   : > { %v3802_v55 = vadd.s32 %v1586_v60, %v1584_v57  ;;  %2351 = vmatpush3.xpose.msk.msra.mxu1 %vm1630_vm4, %v2660_v32  ;;  %v1529_v60 = vcvt.f32.s32 %v3702_v28  ;;  %v1304_v57 = vcvt.f32.s32 %v3763_v19  ;;  %v1306_v28 = vshll.u32 %v1305_v38, 16 }
 0x37d   : > { %v3806_v20 = vpop.xlane.xlu1 %1232  ;;  %v1569_v12 = vpop.xlane.xlu0 %1568  ;;  %vm1626_vm12 = vcmp.eq.s32.totalorder %v4106_v39, %v3841_v26  ;;  %v3869_v36 = vadd.s32 %v1292_v61, %v1290_v52  ;;  %v1276_v38 = vcvt.f32.s32 %v3769_v3  ;;  %v1502_v3 = vshll.u32 %v1501_v8, 16 }
 0x37e   : > { %v1570_v37 = vcvt.f32.s32 %v1569_v12  ;;  %vm1645_vm5 = vcmp.eq.s32.totalorder %v4106_v39, %v3802_v55  ;;  %v1530_v1 = vshll.u32 %v1529_v60, 16  ;;  %v1207_v60 = vcvt.f32.s32 %v3690_v31 }
 0x37f   : > { %2352 = vmatprep.subr.msk.mxu1 %vm1645_vm5, %v2660_v32  ;;  %v3886_v13 = vadd.s32 %v1278_v18, %v1276_v38  ;;  %vm1624_vm0 = vcmp.eq.s32.totalorder %v4106_v39, %v3869_v36  ;;  %v1488_v52 = vshll.u32 %v1487_v54, 16  ;;  %v1473_v61 = vcvt.f32.s32 %v3728_v2 }
 0x380   : > { %v3817_v16 = vadd.s32 %v1572_v40, %v1570_v37  ;;  %2353 = vmatpush3.xpose.msk.msra.mxu1 %vm1629_vm6, %v2660_v32  ;;  %v3855_v37 = vadd.s32 %v1306_v28, %v1304_v57  ;;  %v1431_v54 = vcvt.f32.s32 %v3743_v53 }
 0x381   : > { %v3821_v44 = vpop.xlane.xlu1 %1218  ;;  %v1555_v30 = vpop.xlane.xlu0 %1554  ;;  %vm1623_vm2 = vcmp.eq.s32.totalorder %v4106_v39, %v3886_v13  ;;  %v1474_v8 = vshll.u32 %v1473_v61, 16 }
 0x382   : > { %v1556_v21 = vcvt.f32.s32 %v1555_v30  ;;  %vm1644_vm7 = vcmp.eq.s32.totalorder %v4106_v39, %v3817_v16  ;;  %v1516_v30 = vshll.u32 %v1515_v15, 16  ;;  %vm1625_vm14 = vcmp.eq.s32.totalorder %v4106_v39, %v3855_v37 }
 0x383   : > { %2354 = vmatprep.subr.msk.mxu1 %vm1644_vm7, %v2660_v32  ;;  %v1262_v15 = vcvt.f32.s32 %v3775_v35 }
 0x384   : > { %v3832_v50 = vadd.s32 %v1558_v33, %v1556_v21  ;;  %2355 = vmatpush3.xpose.msk.msra.mxu1 %vm1628_vm8, %v2660_v32 }
 0x385   : > { %v3836_v43 = vpop.xlane.xlu1 %1204  ;;  %v1541_v23 = vpop.xlane.xlu0 %1540 }
 0x386   : > { %v1542_v59 = vcvt.f32.s32 %v1541_v23  ;;  %vm1643_vm9 = vcmp.eq.s32.totalorder %v4106_v39, %v3832_v50 }
 0x387   : > { %2356 = vmatprep.subr.msk.mxu1 %vm1643_vm9, %v2660_v32 }
 0x388   : > { %v3848_v51 = vadd.s32 %v1544_v14, %v1542_v59  ;;  %2357 = vmatpush3.xpose.msk.msra.mxu1 %vm1627_vm10, %v2660_v32  ;;  %v1263_v14 = vcvt.f32.s32 %v3649_v49  ;;  %v1194_v59 = vshll.u32 %v1193_v58, 16  ;;  %v1206_v49 = vcvt.f32.s32 %v3836_v43 }
 0x389   : > { %v1191_v12 = vpop.xlane.xlu1 %1190  ;;  %v1527_v40 = vpop.xlane.xlu0 %1526  ;;  %v1248_v58 = vcvt.f32.s32 %v3791_v22  ;;  %v1459_v22 = vcvt.f32.s32 %v3733_v29 }
 0x38a   : > { %v1528_v19 = vcvt.f32.s32 %v1527_v40  ;;  %vm1642_vm11 = vcmp.eq.s32.totalorder %v4106_v39, %v3848_v51  ;;  %v1192_v4 = vcvt.f32.s32 %v1191_v12  ;;  %v1264_v12 = vshll.u32 %v1263_v14, 16 }
 0x38b   : > { %2358 = vmatprep.subr.msk.mxu1 %vm1642_vm11, %v2660_v32  ;;  %v1249_v40 = vcvt.f32.s32 %v3658_v6  ;;  %v1220_v6 = vcvt.f32.s32 %v3821_v44  ;;  %v1234_v44 = vcvt.f32.s32 %v3806_v20  ;;  %v1460_v29 = vshll.u32 %v1459_v22, 16 }
 0x38c   : > { %v3861_v25 = vadd.s32 %v1530_v1, %v1528_v19  ;;  %2359 = vmatpush3.xpose.msk.msra.mxu1 %vm1626_vm12, %v2660_v32  ;;  %v3893_v31 = vadd.s32 %v1194_v59, %v1192_v4  ;;  %v1221_v1 = vcvt.f32.s32 %v3680_v7  ;;  %v1208_v19 = vshll.u32 %v1207_v60, 16 }
 0x38d   : > { %v1177_v33 = vpop.xlane.xlu1 %1176  ;;  %v1513_v11 = vpop.xlane.xlu0 %1512  ;;  %v1265_v43 = vadd.s32 %v1264_v12, %v1262_v15  ;;  %v1250_v2 = vshll.u32 %v1249_v40, 16  ;;  %v1445_v14 = vcvt.f32.s32 %v3738_v45  ;;  %v1417_v12 = vcvt.f32.s32 %v3748_v63 }
 0x38e   : > { %v1178_v21 = vcvt.f32.s32 %v1177_v33  ;;  %v1514_v24 = vcvt.f32.s32 %v1513_v11  ;;  %vm1641_vm13 = vcmp.eq.s32.totalorder %v4106_v39, %v3861_v25  ;;  %v1209_v7 = vadd.s32 %v1208_v19, %v1206_v49 }
 0x38f   : > { %2360 = vmatprep.subr.msk.mxu1 %vm1641_vm13, %v2660_v32  ;;  %v1222_v33 = vshll.u32 %v1221_v1, 16  ;;  %vm1622_vm4 = vcmp.eq.s32.totalorder %v4106_v39, %v1265_v43  ;;  %v1432_v49 = vshll.u32 %v1431_v54, 16  ;;  %v1418_v19 = vshll.u32 %v1417_v12, 16 }
 0x390   : > { %v3875_v27 = vadd.s32 %v1180_v47, %v1178_v21  ;;  %v3877_v23 = vadd.s32 %v1516_v30, %v1514_v24  ;;  %2361 = vmatpush3.xpose.msk.msra.mxu1 %vm1625_vm14, %v2660_v32  ;;  %v1235_v30 = vcvt.f32.s32 %v3670_v17  ;;  %v1251_v24 = vadd.s32 %v1250_v2, %v1248_v58 }
 0x391   : > { %v1499_v57 = vpop.xlane.xlu0 %1498  ;;  %v1223_v38 = vadd.s32 %v1222_v33, %v1220_v6  ;;  %vm1618_vm12 = vcmp.eq.s32.totalorder %v4106_v39, %v1209_v7  ;;  %vm1617_vm14 = vcmp.eq.s32.totalorder %v4106_v39, %v3893_v31 }
 0x392   : > { %v1500_v28 = vcvt.f32.s32 %v1499_v57  ;;  %1865 = vxpose.xlu0.b32.start [1/16] (narrow) %v3875_v27, 8  ;;  %vm1640_vm15 = vcmp.eq.s32.totalorder %v4106_v39, %v3877_v23  ;;  %v1236_v17 = vshll.u32 %v1235_v30, 16  ;;  %vm1621_vm6 = vcmp.eq.s32.totalorder %v4106_v39, %v1251_v24 }
 0x393   : > { %2362 = vmatprep.subr.msk.mxu1 %vm1640_vm15, %v2660_v32  ;;  %vm1619_vm10 = vcmp.eq.s32.totalorder %v4106_v39, %v1223_v38 }
 0x394   : > { %v3895_v56 = vadd.s32 %v1502_v3, %v1500_v28  ;;  %2363 = vmatpush3.xpose.msk.msra.mxu1 %vm1624_vm0, %v2660_v32  ;;  %v1237_v20 = vadd.s32 %v1236_v17, %v1234_v44  ;;  %v1446_v3 = vshll.u32 %v1445_v14, 16  ;;  %vm1616_vm0 = vcmp.eq.s32.totalorder %v4106_v39, %v3875_v27 }
 0x395   : > { %v1485_v35 = vpop.xlane.xlu0 %1484 }
 0x396   : > { %v1486_v41 = vcvt.f32.s32 %v1485_v35  ;;  %1866 = vxpose.xlu0.b32.cont [2/16] (narrow) %v3893_v31, 8  ;;  %vm1639_vm1 = vcmp.eq.s32.totalorder %v4106_v39, %v3895_v56  ;;  %vm1620_vm8 = vcmp.eq.s32.totalorder %v4106_v39, %v1237_v20  ;;  %v1403_v35 = vcvt.f32.s32 %v3752_v10  ;;  %v1714_v31 = vld [vmem:[#allocation2 + $0x10] sm:$0xff] }
 0x397   : > { %2364 = vmatprep.subr.msk.mxu1 %vm1639_vm1, %v2660_v32 }
 0x398   : > { %v3909_v47 = vadd.s32 %v1488_v52, %v1486_v41  ;;  %2365 = vmatpush3.xpose.msk.msra.mxu1 %vm1623_vm2, %v2660_v32  ;;  %v1404_v41 = vshll.u32 %v1403_v35, 16 }
 0x399   : > { %v1471_v11 = vpop.xlane.xlu0 %1470 }
 0x39a   : > { %v1472_v21 = vcvt.f32.s32 %v1471_v11  ;;  %1867 = vxpose.xlu0.b32.cont [3/16] (narrow) %v1209_v7, 8  ;;  %vm1638_vm3 = vcmp.eq.s32.totalorder %v4106_v39, %v3909_v47 }
 0x39b   : > { %2366 = vmatprep.subr.msk.mxu1 %vm1638_vm3, %v2660_v32 }
 0x39c   : > { %v3919_v4 = vadd.s32 %v1474_v8, %v1472_v21  ;;  %2367 = vmatpush3.xpose.msk.msra.mxu1 %vm1622_vm4, %v2660_v32 }
 0x39d   : > { %v1457_v18 = vpop.xlane.xlu0 %1456 }
 0x39e   : > { %v1458_v60 = vcvt.f32.s32 %v1457_v18  ;;  %1868 = vxpose.xlu0.b32.cont [4/16] (narrow) %v1223_v38, 8  ;;  %vm1637_vm5 = vcmp.eq.s32.totalorder %v4106_v39, %v3919_v4 }
 0x39f   : > { %2368 = vmatprep.subr.msk.mxu1 %vm1637_vm5, %v2660_v32 }
 0x3a0   : > { %v3927_v59 = vadd.s32 %v1460_v29, %v1458_v60  ;;  %2369 = vmatpush3.xpose.msk.msra.mxu1 %vm1621_vm6, %v2660_v32 }
 0x3a1   : > { %v1443_v57 = vpop.xlane.xlu0 %1442 }
 0x3a2   : > { %v1444_v28 = vcvt.f32.s32 %v1443_v57  ;;  %1869 = vxpose.xlu0.b32.cont [5/16] (narrow) %v1237_v20, 8  ;;  %vm1636_vm7 = vcmp.eq.s32.totalorder %v4106_v39, %v3927_v59 }
 0x3a3   : > { %2370 = vmatprep.subr.msk.mxu1 %vm1636_vm7, %v2660_v32 }
 0x3a4   : > { %v1447_v45 = vadd.s32 %v1446_v3, %v1444_v28  ;;  %2371 = vmatpush3.xpose.msk.msra.mxu1 %vm1620_vm8, %v2660_v32 }
 0x3a5   : > { %v1429_v15 = vpop.xlane.xlu0 %1428 }
 0x3a6   : > { %v1430_v40 = vcvt.f32.s32 %v1429_v15  ;;  %1870 = vxpose.xlu0.b32.cont [6/16] (narrow) %v1251_v24, 8  ;;  %vm1635_vm9 = vcmp.eq.s32.totalorder %v4106_v39, %v1447_v45 }
 0x3a7   : > { %2372 = vmatprep.subr.msk.mxu1 %vm1635_vm9, %v2660_v32 }
 0x3a8   : > { %v1433_v53 = vadd.s32 %v1432_v49, %v1430_v40  ;;  %2373 = vmatpush3.xpose.msk.msra.mxu1 %vm1619_vm10, %v2660_v32 }
 0x3a9   : > { %v1415_v1 = vpop.xlane.xlu0 %1414 }
 0x3aa   : > { %v1416_v52 = vcvt.f32.s32 %v1415_v1  ;;  %1871 = vxpose.xlu0.b32.cont [7/16] (narrow) %v1265_v43, 8  ;;  %vm1634_vm11 = vcmp.eq.s32.totalorder %v4106_v39, %v1433_v53 }
 0x3ab   : > { %2374 = vmatprep.subr.msk.mxu1 %vm1634_vm11, %v2660_v32 }
 0x3ac   : > { %v1419_v63 = vadd.s32 %v1418_v19, %v1416_v52  ;;  %2375 = vmatpush3.xpose.msk.msra.mxu1 %vm1618_vm12, %v2660_v32 }
 0x3ad   : > { %v1401_v61 = vpop.xlane.xlu0 %1400 }
 0x3ae   : > { %v1402_v58 = vcvt.f32.s32 %v1401_v61  ;;  %1872 = vxpose.xlu0.b32.cont [8/16] (narrow) %v3886_v13, 8  ;;  %vm1633_vm13 = vcmp.eq.s32.totalorder %v4106_v39, %v1419_v63  ;;  %v1713_v13 = vld [vmem:[#allocation2 + $0x8] sm:$0xff] }
 0x3af   : > { %2376 = vmatprep.subr.msk.mxu1 %vm1633_vm13, %v2660_v32 }
 0x3b0   : > { %v1405_v10 = vadd.s32 %v1404_v41, %v1402_v58  ;;  %2377 = vmatpush3.xpose.msk.msra.mxu1 %vm1617_vm14, %v2660_v32 }
 0x3b2   : > { %1873 = vxpose.xlu0.b32.cont [9/16] (narrow) %v3869_v36, 8  ;;  %1897 = vxpose.xlu1.b32.start [1/16] (narrow) %v1405_v10, 8  ;;  %vm1632_vm15 = vcmp.eq.s32.totalorder %v4106_v39, %v1405_v10  ;;  %v1715_v36 = vld [vmem:[#allocation2 + $0x18] sm:$0xff]  ;;  %v1716_v39 = vld [vmem:[#allocation2 + $0x20] sm:$0xff] }
 0x3b3   : > { %2378 = vmatprep.subr.msk.mxu1 %vm1632_vm15, %v2660_v32 }
 0x3b4   : > { %2379 = vmatpush3.xpose.msk.msra.mxu1 %vm1616_vm0, %v2660_v32  ;;  %v1718_v32 = vld [vmem:[#allocation2 + $0x30] sm:$0xff] }
 0x3b6   : > { %1874 = vxpose.xlu0.b32.cont [10/16] (narrow) %v3855_v37, 8  ;;  %1898 = vxpose.xlu1.b32.cont [2/16] (narrow) %v1419_v63, 8 }
 0x3b7   : > { %2381 = vmatmul.mubr.f32.vlgmr.msra.gmra.mxu1 %v3756_v9  ;;  %v1717_v9 = vld [vmem:[#allocation2 + $0x28] sm:$0xff] }
 0x3b8   : > { %2382 = vmatprep.mubr.f32.mxu1 %v1713_v13 }
 0x3ba   : > { %1875 = vxpose.xlu0.b32.cont [11/16] (narrow) %v3841_v26, 8  ;;  %1899 = vxpose.xlu1.b32.cont [3/16] (narrow) %v1433_v53, 8 }
 0x3bb   : > { %2383 = vmatmul.mubr.f32.gmra.mxu1 %v1713_v13 }
 0x3bc   : > { %2384 = vmatprep.mubr.f32.mxu1 %v1714_v31 }
 0x3be   : > { %1876 = vxpose.xlu0.b32.cont [12/16] (narrow) %v3826_v5, 8  ;;  %1900 = vxpose.xlu1.b32.cont [4/16] (narrow) %v1447_v45, 8 }
 0x3bf   : > { %2385 = vmatmul.mubr.f32.gmra.mxu1 %v1714_v31 }
 0x3c0   : > { %2386 = vmatprep.mubr.f32.mxu1 %v1715_v36 }
 0x3c2   : > { %1877 = vxpose.xlu0.b32.cont [13/16] (narrow) %v3811_v0, 8  ;;  %1901 = vxpose.xlu1.b32.cont [5/16] (narrow) %v3927_v59, 8  ;;  %v1719_v0 = vld [vmem:[#allocation2 + $0x38] sm:$0xff] }
 0x3c3   : > { %2387 = vmatmul.mubr.f32.gmra.mxu1 %v1715_v36 }
 0x3c4   : > { %2388 = vmatprep.mubr.f32.mxu1 %v1716_v39 }
 0x3c6   : > { %1878 = vxpose.xlu0.b32.cont [14/16] (narrow) %v3797_v34, 8  ;;  %1902 = vxpose.xlu1.b32.cont [6/16] (narrow) %v3919_v4, 8 }
 0x3c7   : > { %2389 = vmatmul.mubr.f32.gmra.mxu1 %v1716_v39 }
 0x3c8   : > { %2390 = vmatprep.mubr.f32.mxu1 %v1717_v9 }
 0x3ca   : > { %1879 = vxpose.xlu0.b32.cont [15/16] (narrow) %v3783_v46, 8  ;;  %1903 = vxpose.xlu1.b32.cont [7/16] (narrow) %v3909_v47, 8 }
 0x3cb   : > { %2391 = vmatmul.mubr.f32.gmra.mxu1 %v1717_v9 }
 0x3cc   : > { %2392 = vmatprep.mubr.f32.mxu1 %v1718_v32 }
 0x3ce   : > { %1880 = vxpose.xlu0.b32.end [16/16] (narrow) %v3773_v42, 8  ;;  %1904 = vxpose.xlu1.b32.cont [8/16] (narrow) %v3895_v56, 8 }
 0x3cf   : > { %2393 = vmatmul.mubr.f32.gmra.mxu1 %v1718_v32 }
 0x3d0   : > { %2394 = vmatprep.mubr.f32.mxu1 %v1719_v0 }
 0x3d2   : > { %1905 = vxpose.xlu1.b32.cont [9/16] (narrow) %v3877_v23, 8 }
 0x3d3   : > { %2395 = vmatmul.mubr.f32.gmra.mxu1 %v1719_v0 }
 0x3d6   : > { %1906 = vxpose.xlu1.b32.cont [10/16] (narrow) %v3861_v25, 8 }
 0x3da   : > { %1907 = vxpose.xlu1.b32.cont [11/16] (narrow) %v3848_v51, 8 }
 0x3de   : > { %1908 = vxpose.xlu1.b32.cont [12/16] (narrow) %v3832_v50, 8 }
 0x3e2   : > { %1909 = vxpose.xlu1.b32.cont [13/16] (narrow) %v3817_v16, 8 }
 0x3e6   : > { %1910 = vxpose.xlu1.b32.cont [14/16] (narrow) %v3802_v55, 8 }
 0x3ea   : > { %1911 = vxpose.xlu1.b32.cont [15/16] (narrow) %v3788_v62, 8 }
 0x3ee   : > { %1912 = vxpose.xlu1.b32.end [16/16] (narrow) %v3777_v48, 8 }
 0x3ef   : > { %2588 = shalt.err (!%p2585_p3)
}
 0x3f0   : > { %s2589_s19 = scalar_lea.hbm %s3983_s17, 4096  ;;  %s2593_s13 = scalar_lea.hbm %s4067_s4, 8192 }
 0x3f1   : > { %p2590_p5 = scmp.ne.s32.totalorder %s3983_s17, %s2589_s19  ;;  %p2594_p9 = scmp.lt.s32.totalorder %s3983_s17, %s4067_s4 }
 0x3f2   : > { %p2595_p12 = scmp.lt.s32.totalorder %s2593_s13, %s2589_s19 }
 0x3f3   : > { %p2591_p6 = pnand %p2590_p5, %p2740_p4 }
 0x3f4   : > { %p2596_p10 = por %p2595_p12, %p2594_p9 }
 0x3f5   : > { %p2592_p7 = pneg %p2591_p6 }
 0x3f7   : > { %p2597_p11 = pnand %p2596_p10, %p2592_p7 }
 0x3f9   : > { %2600 = shalt.err (!%p2597_p11)
}
 0x3fa   : > { %s2662_s18 = smov 128   ;;  %s2663_s24 = smov 8   ;;  %v2664_v42 = vmov 1966171168   ;;  %v4107_v62 = vlaneseq }
 0x3fb   : > { %2480 = dma.vmem_to_hbm [thread:$0]  (%p2740_p4), %s3985_s14, 4096, %s3983_s17, %s3989_s8, %s2662_s18, %s2662_s18, %s2663_s24   ;;  %v1931_v48 = vunpack.c.l.s4 %v2664_v42 }
 0x3fc   : > { %v1934_v34 = vshrl.u32 %v4107_v62, 7  ;;  %s2176_s28 = sshll.u32 %s2778_s20, 1  ;;  %vm1946_vm1 = vcmp.lt.s32.totalorder %v4107_v62, 256  ;;  %s4023_s17 = scalar_lea.vmem %s4069_s6, %s2297_s27 }
 0x3fd   : > { %v1932_v46 = vunpack.c.0.s8 %v1931_v48  ;;  %s329_s11 = scalar_lea.vmem %s4068_s5, %s2176_s28 }
 0x3ff   : > { %v1935_v16 = vsub.s32 %v1932_v46, %v1934_v34 }
 0x40e   : > { %v1881_v55 = vpop.trf.xlu0 }
 0x42e   : > { %v1913_v5 = vpop.trf.xlu1 }
 0x42f   : > { %v1929_v50 = vcombine.low %v1881_v55, %v1913_v5 }
 0x431   : > { %v1936_v26 = vrot.slane %v1929_v50, %v1935_v16 }
 0x433   : > { %v1943_v51 = vrot.slane %v1936_v26, %v1935_v16 }
 0x435   : > { %1948 = vst.msk [vmem:[%s329_s11] sm:$0x3] %vm1946_vm1, %v1943_v51 }
 0x477   : > { %v1786_v37 = vpop.f32.mrf.mxu1 }
 0x478   : > { %1949 = vst [vmem:[%s4023_s17] sm:$0xff] %v1786_v37 }
 0x479   : > { %v1788_v25 = vpop.f32.mrf.mxu1 }
 0x47a   : > { %1950 = vst [vmem:[%s4023_s17 + $0x8] sm:$0xff] %v1788_v25 }
 0x47b   : > { %v1792_v27 = vpop.f32.mrf.mxu1 }
 0x47c   : > { %1951 = vst [vmem:[%s4023_s17 + $0x10] sm:$0xff] %v1792_v27 }
 0x47d   : > { %v1794_v23 = vpop.f32.mrf.mxu1 }
 0x47e   : > { %1952 = vst [vmem:[%s4023_s17 + $0x18] sm:$0xff] %v1794_v23 }
 0x47f   : > { %v1798_v56 = vpop.f32.mrf.mxu1 }
 0x480   : > { %1953 = vst [vmem:[%s4023_s17 + $0x20] sm:$0xff] %v1798_v56 }
 0x481   : > { %v1800_v43 = vpop.f32.mrf.mxu1 }
 0x482   : > { %1954 = vst [vmem:[%s4023_s17 + $0x28] sm:$0xff] %v1800_v43 }
 0x483   : > { %v1804_v6 = vpop.f32.mrf.mxu1 }
 0x484   : > { %1955 = vst [vmem:[%s4023_s17 + $0x30] sm:$0xff] %v1804_v6 }
 0x485   : > { %v1806_v7 = vpop.f32.mrf.mxu1 }
 0x486   : > { %1956 = vst [vmem:[%s4023_s17 + $0x38] sm:$0xff] %v1806_v7 }
 0x487   : > { %v1810_v47 = vpop.f32.mrf.mxu1 }
 0x488   : > { %1957 = vst [vmem:[%s4023_s17 + $0x40] sm:$0xff] %v1810_v47 }
 0x489   : > { %v1812_v2 = vpop.f32.mrf.mxu1 }
 0x48a   : > { %1958 = vst [vmem:[%s4023_s17 + $0x48] sm:$0xff] %v1812_v2 }
 0x48b   : > { %v1816_v30 = vpop.f32.mrf.mxu1 }
 0x48c   : > { %1959 = vst [vmem:[%s4023_s17 + $0x50] sm:$0xff] %v1816_v30 }
 0x48d   : > { %v1818_v33 = vpop.f32.mrf.mxu1 }
 0x48e   : > { %1960 = vst [vmem:[%s4023_s17 + $0x58] sm:$0xff] %v1818_v33 }
 0x48f   : > { %v1822_v11 = vpop.f32.mrf.mxu1 }
 0x490   : > { %1961 = vst [vmem:[%s4023_s17 + $0x60] sm:$0xff] %v1822_v11 }
 0x491   : > { %v1824_v8 = vpop.f32.mrf.mxu1 }
 0x492   : > { %1962 = vst [vmem:[%s4023_s17 + $0x68] sm:$0xff] %v1824_v8 }
 0x493   : > { %v1828_v22 = vpop.f32.mrf.mxu1 }
 0x494   : > { %1963 = vst [vmem:[%s4023_s17 + $0x70] sm:$0xff] %v1828_v22 }
 0x495   : > { %v1830_v21 = vpop.f32.mrf.mxu1 }
 0x496   : > { %1964 = vst [vmem:[%s4023_s17 + $0x78] sm:$0xff] %v1830_v21 }
 0x497 PF: > { %p2492_p4 = scmp.ge.s32.totalorder %s2655_s26, 2  ;;  %s2021_s20 = sand.u32 1, %s2635_s21  }
 0x498   : > { %s2022_s27 = scalar_lea.sflag [#allocation4], %s2021_s20 }
 0x499   : > { %p2487_p13 = pnand %p2492_p4, %p2747_p8 }
 0x49b   : > { %p2488_p0 = pneg %p2487_p13 }
 0x49d   : > { %2630 = dma.done.wait (%p2488_p0), %s2022_s27, 4096  }
 0x49e   : > { %2632 = vsyncadd (%p2488_p0), %s2022_s27, 4294963200  ;;  %s21_s26 = sadd.s32 1, %s2655_s26   ;;  %s4108_s21 = smov %s2639_s22 }
 0x49f   : > { %p18_p1 = scmp.ge.s32.totalorder %s21_s26, 4   ;;  %s4109_s22 = smov %s2643_s23 }
 0x4a0   : > { %s4110_s23 = smov %s2753_s10  ;;  %s4111_s24 = smov %s2651_s25 }
 0x4a1   : > { %s4112_s25 = smov %s4114_s29  ;;  %20 = sbr.rel (!%p18_p1) target bundleno = 5 (0x5), region = 100 }
 0x4a6   :  { %2050 = vsyncpa [#allocation3], 1 }
 0x4a7   :  { %2052 = vsyncpa [#allocation3 + $0x1], 1 }
 0x4a8   :  { %2053 = vsyncpa [#allocation4], 1 }
 0x4a9   :  { %2055 = vsyncpa [#allocation4 + $0x1], 1 }

</bundles_post_ra>
